<compile_context>
chip_gen: v6e
topology: v6e:2x2x1
jax: 0.10.0
libtpu: 0.0.40
codegen_flags: <defaults>
</compile_context>

<pallas_src>
import functools

import jax
import jax.numpy as jnp
from jax.experimental import pallas as pl
from jax.experimental.pallas import tpu as pltpu


def _round_up(v, m):
    return (v + m - 1) // m * m


def gfe_an_kernel(*refs, inv_hw, hw, t_hw, use_widen):
    if use_widen:
        (x_ref, w1_ref, w2_ref, wc_ref, bc_ref, widen_ref,
         out_ref, feat_ref, att_ref, acc_ref) = refs
    else:
        (x_ref, w1_ref, w2_ref, wc_ref, bc_ref,
         out_ref, feat_ref, att_ref, acc_ref) = refs
        widen_ref = None

    k = pl.program_id(1)
    n_k = pl.num_programs(1)

    @pl.when(k == 0)
    def _init():
        acc_ref[...] = jnp.zeros_like(acc_ref)

    n_full = t_hw // 128
    rem = t_hw - n_full * 128

    def _accumulate(masked):
        # Deferred reduction: fold the tile's 128-lane chunks into the
        # (tb, c, 128) accumulator with plain VALU adds.  The cross-lane
        # (XLU) reduce happens only once, in the finalize below.
        def load_chunk(j, width):
            chunk = x_ref[:, :, j * 128:j * 128 + width].astype(jnp.float32)
            if masked:
                # Ragged HW tail: zero out lanes past the true spatial extent.
                limit = hw - k * t_hw - j * 128
                lane = jax.lax.broadcasted_iota(jnp.int32, chunk.shape, 2)
                chunk = jnp.where(lane < limit, chunk, 0.0)
            return chunk

        if n_full:
            partial = load_chunk(0, 128)
            for j in range(1, n_full):
                partial = partial + load_chunk(j, 128)
            acc_ref[...] += partial
        if rem:
            tail = load_chunk(n_full, rem)
            acc_ref[:, :, 0:rem] = acc_ref[:, :, 0:rem] + tail

    if hw % t_hw == 0:
        _accumulate(False)          # no ragged tail: unmasked everywhere
    else:
        @pl.when(k < n_k - 1)
        def _body():
            _accumulate(False)

        @pl.when(k == n_k - 1)
        def _tail():
            _accumulate(True)

    @pl.when(k == n_k - 1)
    def _finalize():
        # Single cross-lane reduce per batch tile, then the tiny MXU matmuls.
        pooled = jnp.sum(acc_ref[...], axis=-1) * inv_hw            # (tb, c)

        # SparseAttentionBlock.fc: Linear -> ReLU -> Linear -> Sigmoid
        h = jnp.dot(pooled, w1_ref[...], preferred_element_type=jnp.float32)
        h = jnp.maximum(h, 0.0)
        att = jax.nn.sigmoid(
            jnp.dot(h, w2_ref[...], preferred_element_type=jnp.float32))  # (tb, c_pad)

        # Widen pooled to the lane-dense padded width via a precomputed
        # (c, c_pad) identity (grid-constant input; no per-finalize iota).
        if use_widen:
            pooled_wide = jnp.dot(pooled, widen_ref[...],
                                  preferred_element_type=jnp.float32)
        else:
            pooled_wide = pooled

        # avg_pool(x * att) == avg_pool(x) * att  (att constant over H, W)
        feat = pooled_wide * att                                     # (tb, c_pad)

        # Classifier head (dropout = identity in eval mode).
        out = jnp.dot(feat, wc_ref[...],
                      preferred_element_type=jnp.float32) + bc_ref[...]

        out_ref[...] = out
        feat_ref[...] = feat
        att_ref[...] = att


def gfe_an_forward(x_nchw, w1, w2, wc, bc, *,
                   t_hw_cap=2048,
                   x_buffer_budget_bytes=24 * 1024 * 1024):
    """x_nchw: (B, C, H, W) in any float dtype.  Weights pre-transposed to
       (in, out): w1 (C, C//r), w2 (C//r, C), wc (C, K), bc (1, K)."""
    b, c, h, w = x_nchw.shape
    hw = h * w
    hidden = w1.shape[1]
    num_classes = wc.shape[1]
    assert w1.shape == (c, hidden) and w2.shape == (hidden, c)
    assert wc.shape == (c, num_classes)
    assert bc.shape == (1, num_classes), "classifier bias must be shape (1, K)"

    # ---- aligned / padded sizes (small tensors only) -----------------------
    c_pad = _round_up(c, 128)            # lane-dense width for feat / att
    h_pad = _round_up(hidden, 128)       # lane-dense hidden width
    k_pad = _round_up(num_classes, 128)  # lane-dense classifier width
    use_widen = (c != c_pad)

    # x streamed in native dtype; reshape of contiguous NCHW is layout-free.
    x = x_nchw.reshape(b, c, hw)
    itemsize = x.dtype.itemsize

    # ---- tile sizes ---------------------------------------------------------
    # Batch tile: multiple of 8 (sublanes), grown toward 32 while keeping
    # >= 2 batch tiles (both TensorCores busy on v7x).  Small batches use the
    # full batch; ceil-div grids tolerate a partial last batch tile because
    # every per-row computation is independent.
    if b <= 8:
        tb = b
    else:
        tb = 8
        for cand in (16, 32):
            if b >= 2 * cand:
                tb = cand

    # Spatial tile: full HW when it fits, otherwise a multiple of 128 with a
    # masked tail tile handled in-kernel.
    t_hw_cap = max(128, _round_up(t_hw_cap, 128))
    t_hw = hw if hw <= t_hw_cap else t_hw_cap

    # Shrink the streamed tile if the two pipeline buffers of x would blow the
    # VMEM budget (callers can lower x_buffer_budget_bytes for v7x).
    while 2 * tb * c * t_hw * itemsize > x_buffer_budget_bytes:
        if t_hw > 128:
            t_hw = max(128, (t_hw // 2) // 128 * 128)
        elif tb > 8:
            tb //= 2
        else:
            break

    # ---- tiny weights: pad once, kept resident in VMEM ---------------------
    w1p = jnp.pad(w1.astype(jnp.float32), ((0, 0), (0, h_pad - hidden)))
    w2p = jnp.pad(w2.astype(jnp.float32), ((0, h_pad - hidden), (0, c_pad - c)))
    wcp = jnp.pad(wc.astype(jnp.float32),
                  ((0, c_pad - c), (0, k_pad - num_classes)))
    bcp = jnp.pad(bc.astype(jnp.float32), ((0, 0), (0, k_pad - num_classes)))
    widen = jnp.eye(c, c_pad, dtype=jnp.float32) if use_widen else None

    grid = (pl.cdiv(b, tb), pl.cdiv(hw, t_hw))

    def const_spec(shape):
        return pl.BlockSpec(shape, lambda i, k: (0,) * len(shape))

    in_specs = [
        pl.BlockSpec((tb, c, t_hw), lambda i, k: (i, 0, k)),
        const_spec((c, h_pad)),
        const_spec((h_pad, c_pad)),
        const_spec((c_pad, k_pad)),
        const_spec((1, k_pad)),
    ]
    args = [x, w1p, w2p, wcp, bcp]
    if use_widen:
        in_specs.append(const_spec((c, c_pad)))
        args.append(widen)

    out_shapes = (
        jax.ShapeDtypeStruct((b, k_pad), jnp.float32),   # logits  (padded lanes)
        jax.ShapeDtypeStruct((b, c_pad), jnp.float32),   # features
        jax.ShapeDtypeStruct((b, c_pad), jnp.float32),   # attention weights
    )

    # ---- VMEM sizing: request what is actually needed (+ margin), not 64MiB -
    x_tile_bytes = tb * c * t_hw * itemsize
    w_bytes = 4 * (w1p.size + w2p.size + wcp.size + bcp.size
                   + (widen.size if use_widen else 0))
    acc_bytes = tb * c * 128 * 4
    out_bytes = 4 * tb * (k_pad + 2 * c_pad)
    need = 2 * x_tile_bytes + 2 * w_bytes + acc_bytes + 2 * out_bytes
    vmem_limit = int(min(need + (4 << 20), 48 << 20))
    vmem_limit = int(max(vmem_limit, need + (1 << 20), 16 << 20))

    # Advisory cost: the kernel is HBM-bandwidth bound on streaming x.
    flops = int(b * c * hw
                + 2 * b * (c * h_pad + h_pad * c_pad + c_pad * k_pad
                           + (c * c_pad if use_widen else 0))
                + 2 * b * c_pad)
    bytes_accessed = int(x.size * itemsize + w_bytes
                         + 4 * b * (k_pad + 2 * c_pad))

    kernel = functools.partial(gfe_an_kernel, inv_hw=1.0 / hw, hw=hw,
                               t_hw=t_hw, use_widen=use_widen)

    out_p, feat_p, att_p = pl.pallas_call(
        kernel,
        out_shape=out_shapes,
        grid_spec=pltpu.PrefetchScalarGridSpec(
            num_scalar_prefetch=0,
            grid=grid,
            in_specs=in_specs,
            out_specs=(
                pl.BlockSpec((tb, k_pad), lambda i, k: (i, 0)),
                pl.BlockSpec((tb, c_pad), lambda i, k: (i, 0)),
                pl.BlockSpec((tb, c_pad), lambda i, k: (i, 0)),
            ),
            scratch_shapes=[pltpu.VMEM((tb, c, 128), jnp.float32)],
        ),
        compiler_params=pltpu.CompilerParams(
            dimension_semantics=("parallel", "arbitrary"),
            vmem_limit_bytes=vmem_limit,
        ),
        cost_estimate=pl.CostEstimate(
            flops=flops, transcendentals=int(b * c_pad),
            bytes_accessed=bytes_accessed),
    )(*args)

    # Slice padded lanes back off (mandatory: padded att columns hold 0.5).
    return (out_p[:, :num_classes], feat_p[:, :c], att_p[:, :c])


if __name__ == "__main__":
    # Small, shape-consistent configuration (feature_dim divisible by reduction 16).
    B, C, H, W = 16, 64, 16, 16
    REDUCTION = 16
    HIDDEN = C // REDUCTION          # 4
    NUM_CLASSES = 8

    key = jax.random.PRNGKey(0)
    kx, k1, k2, k3, k4 = jax.random.split(key, 5)

    x = jax.random.normal(kx, (B, C, H, W), dtype=jnp.float32)
    # Parameters stored as (in, out) so the kernel computes x @ W.
    w1 = jax.random.normal(k1, (C, HIDDEN), dtype=jnp.float32) * 0.1       # Linear(C, C//16, bias=False).weight.T
    w2 = jax.random.normal(k2, (HIDDEN, C), dtype=jnp.float32) * 0.1       # Linear(C//16, C, bias=False).weight.T
    wc = jax.random.normal(k3, (C, NUM_CLASSES), dtype=jnp.float32) * 0.1  # classifier weight.T
    bc = jax.random.normal(k4, (1, NUM_CLASSES), dtype=jnp.float32) * 0.1  # classifier bias

    # t_hw_cap=128 -> grid = (2, 2): exercises both the parallel batch axis
    # (2 tiles -> both TCs on v7x) and the deferred-reduction accumulation path.
    out, feat, att = gfe_an_forward(x, w1, w2, wc, bc, t_hw_cap=128)
    jax.block_until_ready((out, feat, att))

    # Pure-JAX reference of the exact PyTorch forward semantics (eval mode).
    pooled_ref = jnp.mean(x, axis=(2, 3))                               # (B, C)
    att_ref = jax.nn.sigmoid(jnp.maximum(pooled_ref @ w1, 0.0) @ w2)    # (B, C)
    feat_ref = jnp.mean(x * att_ref[:, :, None, None], axis=(2, 3))     # (B, C)
    out_ref = feat_ref @ wc + bc                                        # (B, K)

    assert out.shape == (B, NUM_CLASSES)
    assert feat.shape == (B, C) and att.shape == (B, C)
    assert jnp.allclose(out, out_ref, atol=1e-4, rtol=1e-4)
    assert jnp.allclose(feat, feat_ref, atol=1e-4, rtol=1e-4)
    assert jnp.allclose(att, att_ref, atol=1e-4, rtol=1e-4)

    print("KERNEL_OK")
</pallas_src>

<mosaic_0001>
module attributes {stable_mosaic.version = 11 : i64} {
  func.func @gfe_an_kernel(%arg0: i32, %arg1: i32, %arg2: memref<8x64x128xf32, #tpu.memory_space<vmem>>, %arg3: memref<64x128xf32, #tpu.memory_space<vmem>>, %arg4: memref<128x128xf32, #tpu.memory_space<vmem>>, %arg5: memref<128x128xf32, #tpu.memory_space<vmem>>, %arg6: memref<1x128xf32, #tpu.memory_space<vmem>>, %arg7: memref<64x128xf32, #tpu.memory_space<vmem>>, %arg8: memref<8x128xf32, #tpu.memory_space<vmem>>, %arg9: memref<8x128xf32, #tpu.memory_space<vmem>>, %arg10: memref<8x128xf32, #tpu.memory_space<vmem>>, %arg11: memref<8x64x128xf32, #tpu.memory_space<vmem>>) attributes {dimension_semantics = [#tpu.dimension_semantics<parallel>, #tpu.dimension_semantics<arbitrary>], iteration_bounds = array<i64: 2, 2>, scalar_prefetch = 0 : i64, scratch_operands = 1 : i64, tpu.core_type = #tpu.core_type<tc>, window_params = [{transform_indices = @transform_0, window_bounds = array<i64: 8, 64, 128>}, {pipeline_mode = #tpu.pipeline_mode<synchronous>, transform_indices = @transform_1, window_bounds = array<i64: 64, 128>}, {pipeline_mode = #tpu.pipeline_mode<synchronous>, transform_indices = @transform_2, window_bounds = array<i64: 128, 128>}, {pipeline_mode = #tpu.pipeline_mode<synchronous>, transform_indices = @transform_3, window_bounds = array<i64: 128, 128>}, {pipeline_mode = #tpu.pipeline_mode<synchronous>, transform_indices = @transform_4, window_bounds = array<i64: 1, 128>}, {pipeline_mode = #tpu.pipeline_mode<synchronous>, transform_indices = @transform_5, window_bounds = array<i64: 64, 128>}, {transform_indices = @transform_6, window_bounds = array<i64: 8, 128>}, {transform_indices = @transform_7, window_bounds = array<i64: 8, 128>}, {transform_indices = @transform_8, window_bounds = array<i64: 8, 128>}]} {
    %c0_i32 = arith.constant 0 : i32
    %0 = arith.cmpi eq, %arg1, %c0_i32 : i32
    %1 = arith.extui %0 : i1 to i32
    %c0_i32_0 = arith.constant 0 : i32
    %2 = arith.cmpi ne, %1, %c0_i32_0 : i32
    scf.if %2 {
      %cst = arith.constant 0.000000e+00 : f32
      %10 = vector.broadcast %cst : f32 to vector<8x64x128xf32>
      %c0_10 = arith.constant 0 : index
      %c0_11 = arith.constant 0 : index
      %c0_12 = arith.constant 0 : index
      %11 = vector.load %arg11[%c0_10, %c0_11, %c0_12] : memref<8x64x128xf32, #tpu.memory_space<vmem>>, vector<8x64x128xf32>
      tpu.vector_store %arg11[%c0_10, %c0_11, %c0_12], %10 {strides = array<i32>} : memref<8x64x128xf32, #tpu.memory_space<vmem>>, vector<8x64x128xf32>,
    } else {
    }
    %c0 = arith.constant 0 : index
    %c0_1 = arith.constant 0 : index
    %c0_2 = arith.constant 0 : index
    %3 = vector.load %arg2[%c0, %c0_1, %c0_2] : memref<8x64x128xf32, #tpu.memory_space<vmem>>, vector<8x64x128xf32>
    %c0_3 = arith.constant 0 : index
    %c0_4 = arith.constant 0 : index
    %c0_5 = arith.constant 0 : index
    %4 = vector.load %arg11[%c0_3, %c0_4, %c0_5] : memref<8x64x128xf32, #tpu.memory_space<vmem>>, vector<8x64x128xf32>
    %5 = arith.addf %4, %3 : vector<8x64x128xf32>
    %c0_6 = arith.constant 0 : index
    %c0_7 = arith.constant 0 : index
    %c0_8 = arith.constant 0 : index
    %6 = vector.load %arg11[%c0_6, %c0_7, %c0_8] : memref<8x64x128xf32, #tpu.memory_space<vmem>>, vector<8x64x128xf32>
    tpu.vector_store %arg11[%c0_6, %c0_7, %c0_8], %5 {strides = array<i32>} : memref<8x64x128xf32, #tpu.memory_space<vmem>>, vector<8x64x128xf32>,
    %c1_i32 = arith.constant 1 : i32
    %7 = arith.cmpi eq, %arg1, %c1_i32 : i32
    %8 = arith.extui %7 : i1 to i32
    %c0_i32_9 = arith.constant 0 : i32
    %9 = arith.cmpi ne, %8, %c0_i32_9 : i32
    scf.if %9 {
      %c0_10 = arith.constant 0 : index
      %c0_11 = arith.constant 0 : index
      %c0_12 = arith.constant 0 : index
      %10 = vector.load %arg11[%c0_10, %c0_11, %c0_12] : memref<8x64x128xf32, #tpu.memory_space<vmem>>, vector<8x64x128xf32>
      %cst = arith.constant dense<0.000000e+00> : vector<8x64xf32>
      %11 = vector.multi_reduction <add>, %10, %cst [2] : vector<8x64x128xf32> to vector<8x64xf32>
      %cst_13 = arith.constant 3.906250e-03 : f32
      %12 = vector.broadcast %cst_13 : f32 to vector<8x64xf32>
      %13 = arith.mulf %11, %12 : vector<8x64xf32>
      %c0_14 = arith.constant 0 : index
      %c0_15 = arith.constant 0 : index
      %14 = vector.load %arg3[%c0_14, %c0_15] : memref<64x128xf32, #tpu.memory_space<vmem>>, vector<64x128xf32>
      %cst_16 = arith.constant dense<0.000000e+00> : vector<8x128xf32>
      %15 = tpu.matmul %13, %14, %cst_16 {dimension_numbers = #tpu.dot_dimension_numbers<[1], [0], [0], [1], [0, 0, 1, 1], [], []>} : vector<8x64xf32>, vector<64x128xf32>, vector<8x128xf32> -> vector<8x128xf32>
      %cst_17 = arith.constant 0.000000e+00 : f32
      %16 = vector.broadcast %cst_17 : f32 to vector<8x128xf32>
      %17 = arith.maximumf %15, %16 : vector<8x128xf32>
      %c0_18 = arith.constant 0 : index
      %c0_19 = arith.constant 0 : index
      %18 = vector.load %arg4[%c0_18, %c0_19] : memref<128x128xf32, #tpu.memory_space<vmem>>, vector<128x128xf32>
      %cst_20 = arith.constant dense<0.000000e+00> : vector<8x128xf32>
      %19 = tpu.matmul %17, %18, %cst_20 {dimension_numbers = #tpu.dot_dimension_numbers<[1], [0], [0], [1], [0, 0, 1, 1], [], []>} : vector<8x128xf32>, vector<128x128xf32>, vector<8x128xf32> -> vector<8x128xf32>
      %20 = arith.negf %19 : vector<8x128xf32>
      %21 = math.exp %20 : vector<8x128xf32>
      %cst_21 = arith.constant 1.000000e+00 : f32
      %22 = vector.broadcast %cst_21 : f32 to vector<8x128xf32>
      %23 = arith.addf %22, %21 : vector<8x128xf32>
      %24 = arith.divf %22, %23 : vector<8x128xf32>
      %c0_22 = arith.constant 0 : index
      %c0_23 = arith.constant 0 : index
      %25 = vector.load %arg7[%c0_22, %c0_23] : memref<64x128xf32, #tpu.memory_space<vmem>>, vector<64x128xf32>
      %cst_24 = arith.constant dense<0.000000e+00> : vector<8x128xf32>
      %26 = tpu.matmul %13, %25, %cst_24 {dimension_numbers = #tpu.dot_dimension_numbers<[1], [0], [0], [1], [0, 0, 1, 1], [], []>} : vector<8x64xf32>, vector<64x128xf32>, vector<8x128xf32> -> vector<8x128xf32>
      %27 = arith.mulf %26, %24 : vector<8x128xf32>
      %c0_25 = arith.constant 0 : index
      %c0_26 = arith.constant 0 : index
      %28 = vector.load %arg5[%c0_25, %c0_26] : memref<128x128xf32, #tpu.memory_space<vmem>>, vector<128x128xf32>
      %cst_27 = arith.constant dense<0.000000e+00> : vector<8x128xf32>
      %29 = tpu.matmul %27, %28, %cst_27 {dimension_numbers = #tpu.dot_dimension_numbers<[1], [0], [0], [1], [0, 0, 1, 1], [], []>} : vector<8x128xf32>, vector<128x128xf32>, vector<8x128xf32> -> vector<8x128xf32>
      %c0_28 = arith.constant 0 : index
      %c0_29 = arith.constant 0 : index
      %30 = vector.load %arg6[%c0_28, %c0_29] : memref<1x128xf32, #tpu.memory_space<vmem>>, vector<1x128xf32>
      %31 = vector.broadcast %30 : vector<1x128xf32> to vector<8x128xf32>
      %32 = arith.addf %29, %31 : vector<8x128xf32>
      %c0_30 = arith.constant 0 : index
      %c0_31 = arith.constant 0 : index
      %33 = vector.load %arg8[%c0_30, %c0_31] : memref<8x128xf32, #tpu.memory_space<vmem>>, vector<8x128xf32>
      tpu.vector_store %arg8[%c0_30, %c0_31], %32 {strides = array<i32>} : memref<8x128xf32, #tpu.memory_space<vmem>>, vector<8x128xf32>,
      %c0_32 = arith.constant 0 : index
      %c0_33 = arith.constant 0 : index
      %34 = vector.load %arg9[%c0_32, %c0_33] : memref<8x128xf32, #tpu.memory_space<vmem>>, vector<8x128xf32>
      tpu.vector_store %arg9[%c0_32, %c0_33], %27 {strides = array<i32>} : memref<8x128xf32, #tpu.memory_space<vmem>>, vector<8x128xf32>,
      %c0_34 = arith.constant 0 : index
      %c0_35 = arith.constant 0 : index
      %35 = vector.load %arg10[%c0_34, %c0_35] : memref<8x128xf32, #tpu.memory_space<vmem>>, vector<8x128xf32>
      tpu.vector_store %arg10[%c0_34, %c0_35], %24 {strides = array<i32>} : memref<8x128xf32, #tpu.memory_space<vmem>>, vector<8x128xf32>,
    } else {
    }
    return
  }
  func.func @transform_0(%arg0: i32, %arg1: i32) -> (i32, i32, i32) {
    %c0_i32 = arith.constant 0 : i32
    %c0_i32_0 = arith.constant 0 : i32
    return %arg0, %c0_i32, %arg1 : i32, i32, i32
  }
  func.func @transform_1(%arg0: i32, %arg1: i32) -> (i32, i32) {
    %c0_i32 = arith.constant 0 : i32
    %c0_i32_0 = arith.constant 0 : i32
    %c0_i32_1 = arith.constant 0 : i32
    return %c0_i32, %c0_i32_0 : i32, i32
  }
  func.func @transform_2(%arg0: i32, %arg1: i32) -> (i32, i32) {
    %c0_i32 = arith.constant 0 : i32
    %c0_i32_0 = arith.constant 0 : i32
    %c0_i32_1 = arith.constant 0 : i32
    return %c0_i32, %c0_i32_0 : i32, i32
  }
  func.func @transform_3(%arg0: i32, %arg1: i32) -> (i32, i32) {
    %c0_i32 = arith.constant 0 : i32
    %c0_i32_0 = arith.constant 0 : i32
    %c0_i32_1 = arith.constant 0 : i32
    return %c0_i32, %c0_i32_0 : i32, i32
  }
  func.func @transform_4(%arg0: i32, %arg1: i32) -> (i32, i32) {
    %c0_i32 = arith.constant 0 : i32
    %c0_i32_0 = arith.constant 0 : i32
    %c0_i32_1 = arith.constant 0 : i32
    return %c0_i32, %c0_i32_0 : i32, i32
  }
  func.func @transform_5(%arg0: i32, %arg1: i32) -> (i32, i32) {
    %c0_i32 = arith.constant 0 : i32
    %c0_i32_0 = arith.constant 0 : i32
    %c0_i32_1 = arith.constant 0 : i32
    return %c0_i32, %c0_i32_0 : i32, i32
  }
  func.func @transform_6(%arg0: i32, %arg1: i32) -> (i32, i32) {
    %c0_i32 = arith.constant 0 : i32
    %c0_i32_0 = arith.constant 0 : i32
    return %arg0, %c0_i32 : i32, i32
  }
  func.func @transform_7(%arg0: i32, %arg1: i32) -> (i32, i32) {
    %c0_i32 = arith.constant 0 : i32
    %c0_i32_0 = arith.constant 0 : i32
    return %arg0, %c0_i32 : i32, i32
  }
  func.func @transform_8(%arg0: i32, %arg1: i32) -> (i32, i32) {
    %c0_i32 = arith.constant 0 : i32
    %c0_i32_0 = arith.constant 0 : i32
    return %arg0, %c0_i32 : i32, i32
  }
}

</mosaic_0001>

<bundles_post_ra>
// kernel: tpu_custom_call.1
= control target key start
LH: loop header
LB: loop body
LE: loop exit
PB: predicated region body
PF: predicated region fallthrough
CT: control target
= control target key end

     0   :  { %s3434_s0 = inlined_call_operand.hbm [shape: f32[16,64,256], index: 0, kind: input, shape index: {}]   ;;  %s3435_s1 = inlined_call_operand.hbm [shape: f32[64,128], index: 1, kind: input, shape index: {}]   ;;  %s3436_s2 = inlined_call_operand.hbm [shape: f32[128,128], index: 2, kind: input, shape index: {}]   ;;  %s3437_s3 = inlined_call_operand.hbm [shape: f32[128,128], index: 3, kind: input, shape index: {}]   ;;  %s3438_s4 = inlined_call_operand.vmem [shape: f32[1,128], index: 4, kind: input, shape index: {}]   ;;  %s3439_s5 = inlined_call_operand.hbm [shape: f32[64,128], index: 5, kind: input, shape index: {}]   ;;  %s3440_s6 = inlined_call_operand.hbm [shape: f32[16,128], index: 6, kind: output, shape index: {0}]   ;;  %s3441_s7 = inlined_call_operand.hbm [shape: f32[16,128], index: 7, kind: output, shape index: {1}]   ;;  %s3442_s8 = inlined_call_operand.hbm [shape: f32[16,128], index: 8, kind: output, shape index: {2}]  }
   0x1   :  { %3457 = sst [smem:[#allocation26_spill]] %s3434_s0 }
   0x2   :  { %3458 = sst [smem:[#allocation27_spill]] %s3435_s1 }
   0x3   :  { %3459 = sst [smem:[#allocation28_spill]] %s3436_s2 }
   0x4   :  { %3460 = sst [smem:[#allocation29_spill]] %s3437_s3 }
   0x5   :  { %3461 = sst [smem:[#allocation30_spill]] %s3438_s4 }
   0x6   :  { %3462 = sst [smem:[#allocation31_spill]] %s3439_s5 }
   0x7   :  { %3463 = sst [smem:[#allocation32_spill]] %s3440_s6 }
   0x8   :  { %3464 = sst [smem:[#allocation33_spill]] %s3441_s7 }
   0x9   :  { %3465 = sst [smem:[#allocation34_spill]] %s3442_s8 }
   0xa   :  { %14 = vsyncpa [#allocation4], 0 }
   0xb   :  { %16 = vsyncpa [#allocation4 + $0x1], 0 }
   0xc   :  { %17 = vsyncpa [#allocation7], 0 }
   0xd   :  { %18 = vsyncpa [#allocation10], 0 }
   0xe   :  { %19 = vsyncpa [#allocation5], 0 }
   0xf   :  { %21 = vsyncpa [#allocation5 + $0x1], 0 }
  0x10   :  { %22 = vsyncpa [#allocation14], 0 }
  0x11   :  { %24 = vsyncpa [#allocation14 + $0x1], 0  ;;  %s2724_s27 = smov 0   ;;  %s2726_s28 = smov 0  }
  0x12   :  { %s2728_s29 = smov 0   ;;  %s2730_s30 = smov 0  }
  0x13   :  { %s2732_s9 = smov 0   ;;  %s2734_s10 = smov 0  }
  0x14   :  { %s2736_s11 = smov 0   ;;  %s2738_s12 = smov 0  }
  0x15   :  { %s2740_s13 = smov 0   ;;  %s2742_s14 = smov 0  }
  0x16   :  { %s2744_s15 = smov 0  }
  0x17 LB: > { %3466 = sst [smem:[#allocation21_spill]] %s2623_s27  ;;  %s2778_s16 = sadd.s32 4294967295, %s2663_s15   ;;  %s2663_s15 = sphi %s2744_s15, %s30_s15   ;;  %s2659_s14 = sphi %s2742_s14, %s3511_s14   ;;  %s2655_s13 = sphi %s2740_s13, %s3510_s13   ;;  %s2651_s12 = sphi %s2738_s12, %s3509_s12   ;;  %s2647_s11 = sphi %s2736_s11, %s3508_s11   ;;  %s2643_s10 = sphi %s2734_s10, %s3507_s10   ;;  %s2639_s9 = sphi %s2732_s9, %s3506_s9   ;;  %s2635_s30 = sphi %s2730_s30, %s3505_s30   ;;  %s2631_s29 = sphi %s2728_s29, %s3504_s29   ;;  %s2627_s28 = sphi %s2726_s28, %s3503_s28   ;;  %s2623_s27 = sphi %s2724_s27, %s3502_s27  }
  0x18   : > { %3467 = sst [smem:[#allocation22_spill]] %s2651_s12  ;;  %s3443_s17 = sadd.s32 4294967294, %s2663_s15  }
  0x19   : > { %p64_p0 = scmp.ne.s32.totalorder %s2639_s9, %s2635_s30  ;;  %p3448_p1 = scmp.eq.s32.totalorder %s2778_s16, 0 }
  0x1a   : > { %p192_p2 = scmp.ne.s32.totalorder %s2631_s29, %s2627_s28  ;;  %p193_p3 = scmp.eq.s32.totalorder %s2778_s16, 3 }
  0x1b   : > { %p2788_p4 = por %p3448_p1, %p64_p0  ;;  %p198_p5 = scmp.ne.s32.totalorder %s2627_s28, %s2623_s27 }
  0x1c   : > { %p2794_p6 = por %p193_p3, %p192_p2  ;;  %p199_p7 = scmp.eq.s32.totalorder %s3443_s17, 3 }
  0x1d   : > { %p1990_p8 = scmp.ge.s32.totalorder %s2663_s15, 1  ;;  %p258_p9 = scmp.lt.s32.totalorder %s2663_s15, 5 }
  0x1e   : > { %s3469_s19 = scalar_select %p2794_p6, 1, 0 }
  0x1f   : > { %p2802_p10 = por %p199_p7, %p198_p5  ;;  %p2806_p11 = pnand %p1990_p8, %p258_p9 }
  0x20   : > { %3470 = sst [smem:[#allocation23_spill]] %s3469_s19  ;;  %s2665_s22 = smov [#allocation6]  }
  0x21   : > { %s3471_s20 = scalar_select %p2802_p10, 1, 0 }
  0x22   : > { %s270_s23 = sshll.u32 %s2665_s22, 4  ;;  %p2208_p12 = pneg %p2806_p11  ;;  %s271_s23 = int_to_ptr.vmem [resolvable:$true] %s270_s23 }
  0x23   : > { %3472 = sst [smem:[#allocation24_spill]] %s3471_s20  ;;  %s2666_s25 = smov [#allocation9]  }
  0x24   : > { %p2814_p13 = pnand %p2208_p12, %p3448_p1  ;;  %s296_s26 = sshll.u32 %s2666_s25, 4  ;;  %s297_s26 = int_to_ptr.vmem [resolvable:$true] %s296_s26 }
  0x25   : > { %s2358_s30 = scalar_lea.vmem %s271_s23, 1024  ;;  %p2366_p7 = scmp.lt.s32.totalorder %s271_s23, %s271_s23 }
  0x26   : > { %p2349_p0 = pneg %p2814_p13  ;;  %p2359_p2 = scmp.ne.s32.totalorder %s271_s23, %s2358_s30 }
  0x27   : > { %p2367_p8 = scmp.lt.s32.totalorder %s2358_s30, %s2358_s30 }
  0x28   : > { %p2361_p3 = pnand %p2359_p2, %p2349_p0 }
  0x29   : > { %p2368_p9 = por %p2367_p8, %p2366_p7 }
  0x2a   : > { %p2362_p5 = pneg %p2361_p3 }
  0x2c   : > { %p2369_p12 = pnand %p2368_p9, %p2362_p5 }
  0x2e   : > { %2372 = shalt.err (!%p2369_p12)
}
  0x2f   : > { %s3449_s22 = smov 128   ;;  %s3450_s17 = smov 8  }
  0x30   : > { %s3475_s1 = sld [smem:[#allocation27_spill]]  ;;  %s2384_s27 = scalar_lea.vmem %s297_s26, 2048 }
  0x31   : > { %p2385_p2 = scmp.ne.s32.totalorder %s297_s26, %s2384_s27  ;;  %p2392_p5 = scmp.lt.s32.totalorder %s297_s26, %s297_s26 }
  0x32   : > { %p2393_p8 = scmp.lt.s32.totalorder %s2384_s27, %s2384_s27 }
  0x33   : > { %p2387_p3 = pnand %p2385_p2, %p2349_p0 }
  0x34   : > { %p2394_p9 = por %p2393_p8, %p2392_p5 }
  0x35   : > { %p2388_p7 = pneg %p2387_p3 }
  0x36   : > { %2211 = dma.hbm_to_vmem [thread:$0]  (!%p2814_p13), %s3475_s1, 1024, %s271_s23, [#allocation7], %s3449_s22, %s3449_s22, %s3450_s17  }
  0x37   : > { %p2395_p12 = pnand %p2394_p9, %p2388_p7 }
  0x39   : > { %2398 = shalt.err (!%p2395_p12)
}
  0x3a   : > { %s3476_s3 = sld [smem:[#allocation29_spill]]  ;;  %s2669_s20 = smov [#allocation8]  }
  0x3b   : > { %s283_s23 = sshll.u32 %s2669_s20, 4  ;;  %s2670_s25 = smov [#allocation11]   ;;  %s284_s23 = int_to_ptr.vmem [resolvable:$true] %s283_s23 }
  0x3c   : > { %s312_s1 = sshll.u32 %s2670_s25, 4  ;;  %s2410_s6 = scalar_lea.vmem %s284_s23, 2048  ;;  %s313_s1 = int_to_ptr.vmem [resolvable:$true] %s312_s1 }
  0x3d   : > { %p2411_p2 = scmp.ne.s32.totalorder %s284_s23, %s2410_s6  ;;  %p2418_p5 = scmp.lt.s32.totalorder %s284_s23, %s284_s23 }
  0x3e   : > { %p2419_p8 = scmp.lt.s32.totalorder %s2410_s6, %s2410_s6 }
  0x3f   : > { %p2413_p3 = pnand %p2411_p2, %p2349_p0 }
  0x40   : > { %2217 = dma.hbm_to_vmem [thread:$0]  (!%p2814_p13), %s3476_s3, 2048, %s297_s26, [#allocation10], %s3449_s22, %s3449_s22, %s3450_s17  }
  0x41   : > { %p2414_p7 = pneg %p2413_p3  ;;  %p2420_p9 = por %p2419_p8, %p2418_p5 }
  0x43   : > { %p2421_p12 = pnand %p2420_p9, %p2414_p7 }
  0x45   : > { %2424 = shalt.err (!%p2421_p12)
}
  0x46   : > { %s3477_s2 = sld [smem:[#allocation28_spill]]  ;;  %s2436_s26 = scalar_lea.vmem %s313_s1, 1024 }
  0x47   : > { %p2437_p1 = scmp.ne.s32.totalorder %s313_s1, %s2436_s26  ;;  %p2444_p5 = scmp.lt.s32.totalorder %s313_s1, %s313_s1 }
  0x48   : > { %p2445_p7 = scmp.lt.s32.totalorder %s2436_s26, %s2436_s26 }
  0x49   : > { %p2439_p2 = pnand %p2437_p1, %p2349_p0 }
  0x4a   : > { %p2446_p8 = por %p2445_p7, %p2444_p5 }
  0x4b   : > { %p2440_p3 = pneg %p2439_p2 }
  0x4c   : > { %2214 = dma.hbm_to_vmem [thread:$0]  (!%p2814_p13), %s3477_s2, 2048, %s284_s23, [#allocation7], %s3449_s22, %s3449_s22, %s3450_s17  }
  0x4d   : > { %p2447_p9 = pnand %p2446_p8, %p2440_p3 }
  0x4f   : > { %2450 = shalt.err (!%p2447_p9)
}
  0x50   : > { %s3478_s5 = sld [smem:[#allocation31_spill]]  ;;  %s39_s24 = sadd.s32 1, %s2655_s13 }
  0x51   : > { %p40_p1 = scmp.ge.s32.totalorder %s39_s24, 2  ;;  %s42_s20 = sadd.s32 1, %s2659_s14 }
  0x52   : > { %s51_s23 = sadd.s32 1, %s2643_s10  ;;  %p58_p0 = scmp.ne.s32.totalorder %s2643_s10, %s2639_s9 }
  0x53   : > { %s3513_s24 = smov (%p40_p1, %s39_s24), 0  ;;  %s3515_s20 = smov (!%p40_p1, %s42_s20), %s2659_s14 }
  0x54   : > { %3479 = sst [smem:[#allocation25_spill]] %s3513_s24  ;;  %s47_s25 = ssub.s32 %s2655_s13, %s3513_s24 }
  0x55   : > { %p59_p12 = scmp.eq.s32.totalorder %s2663_s15, 0  ;;  %p44_p2 = scmp.ge.s32.totalorder %s3515_s20, 2 }
  0x56   : > { %2220 = dma.hbm_to_vmem [thread:$0]  (!%p2814_p13), %s3478_s5, 1024, %s313_s1, [#allocation10], %s3449_s22, %s3449_s22, %s3450_s17  }
  0x57   : > { %s182_s8 = sadd.s32 1, %s2631_s29  ;;  %p2876_p3 = por %p59_p12, %p58_p0 }
  0x58   : > { %p2239_p13 = scmp.lt.s32.totalorder %s2663_s15, 4  ;;  %s3517_s20 = smov (%p44_p2, %s3515_s20), 0 }
  0x59   : > { %s326_s27 = sand.u32 1, %s2643_s10   ;;  %s2023_s26 = sshll.u32 %s2659_s14, 7 }
  0x5a   : > { %s46_s6 = ssub.s32 %s2659_s14, %s3517_s20  ;;  %s1996_s22 = sshll.u32 %s326_s27, 9 }
  0x5b   : > { %s48_s30 = sor.u32 %s47_s25, %s46_s6  ;;  %p180_p5 = scmp.eq.s32.totalorder %s46_s6, 0 }
  0x5c   : > { %p49_p7 = scmp.eq.s32.totalorder %s48_s30, 0  ;;  %s336_s3 = sadd.s32 %s2655_s13, %s2023_s26 }
  0x5d   : > { %s2888_s17 = scalar_select %p180_p5, %s2631_s29, %s182_s8  }
  0x5e   : > { %s2891_s2 = scalar_select %p49_p7, %s2643_s10, %s51_s23  }
  0x5f   : > { %s1999_s5 = sshll.u32 %s336_s3, 7  ;;  %s330_s24 = scalar_lea.vmem [#allocation3], %s1996_s22 }
  0x60   : > { %s339_s7 = sshll.u32 %s330_s24, 4  ;;  %s3481_s0 = sld [smem:[#allocation26_spill]]  ;;  %s340_s7 = int_to_ptr.vmem [resolvable:$true] %s339_s7 }
  0x61   : > { %p2901_p8 = pnand %p2239_p13, %p2876_p3  ;;  %s327_s8 = scalar_lea.sflag [#allocation4], %s326_s27 }
  0x62   : > { %s2464_s23 = scalar_lea.vmem %s340_s7, 8192  ;;  %s2671_s3 = smov [#allocation3]  }
  0x63   : > { %p2453_p9 = pneg %p2901_p8  ;;  %p2465_p1 = scmp.ne.s32.totalorder %s340_s7, %s2464_s23 }
  0x64   : > { %s2469_s22 = sshll.u32 %s2671_s3, 4  ;;  %s2470_s22 = int_to_ptr.vmem [resolvable:$false] %s2469_s22 }
  0x65   : > { %p2467_p0 = pnand %p2465_p1, %p2453_p9  ;;  %s2471_s12 = scalar_lea.vmem %s2470_s22, 16384 }
  0x66   : > { %s338_s4 = scalar_lea.hbm %s3481_s0, %s1999_s5  ;;  %p2472_p2 = scmp.lt.s32.totalorder %s340_s7, %s2470_s22 }
  0x67   : > { %p2468_p12 = pneg %p2467_p0  ;;  %p2473_p5 = scmp.lt.s32.totalorder %s2471_s12, %s2464_s23 }
  0x69   : > { %p2474_p7 = por %p2473_p5, %p2472_p2 }
  0x6b   : > { %p2475_p10 = pnand %p2474_p7, %p2468_p12 }
  0x6d   : > { %2478 = shalt.err (!%p2475_p10)
}
  0x6e   : > { %s2672_s5 = smov 256   ;;  %s3483_s19 = smov 8  }
  0x6f   : > { %s3484_s24 = smov 128   ;;  %351 = sbr.rel (%p2806_p11) target bundleno = 1180 (0x49c), region = 44 }
  0x70   : > { %2224 = dma.hbm_to_vmem [thread:$0]  (!%p2901_p8), %s338_s4, 8192, %s340_s7, %s327_s8, %s2672_s5, %s3484_s24, %s3483_s19  }
  0x71   : > { %s353_s1 = sand.u32 (!%p2806_p11), 1, %s2639_s9  }
  0x72   : > { %s2001_s27 = sshll.u32 (!%p2806_p11), %s353_s1, 9  ;;  %s354_s26 = scalar_lea.sflag (!%p2806_p11), [#allocation4], %s353_s1 }
  0x73   : > { %s2914_s6 = scalar_lea.vmem (!%p2806_p11), [#allocation3], %s2001_s27 }
  0x74   : > { %2602 = dma.done.wait (%p2788_p4), %s354_s26, 8192  }
  0x75   : > { %2604 = vsyncadd (%p2788_p4), %s354_s26, 4294959104  ;;  %p3485_p10 = scmp.eq.s32.totalorder %s2778_s16, 0 }
  0x77   : > { %2606 = dma.done.wait (%p3485_p10), [#allocation7], 3072   ;;  %p3486_p3 = pmov %p3485_p10 }
  0x79   : > { %2608 = vsyncadd (%p3486_p3), [#allocation7], 4294964224  ;;  %p3487_p11 = pmov %p3486_p3 }
  0x7a   : > { %p3488_p13 = pmov %p3486_p3 }
  0x7b   : > { %2610 = dma.done.wait (%p3487_p11), [#allocation10], 3072  }
  0x7c   : > { %2612 = vsyncadd (%p3488_p13), [#allocation10], 4294964224  ;;  %s3455_s4 = sand.u32 1, %s2627_s28   ;;  %p2009_p4 = scmp.ne.s32.totalorder %s2647_s11, 0 }
  0x7d   : > { %s2931_s7 = sshll.u32 %s3455_s4, 3 }
  0x7e   : > { %s401_s18 = scalar_lea.vmem [#allocation12], %s2931_s7  ;;  %s408_s21 = scalar_lea.vmem [#allocation13], %s2931_s7 }
  0x7f   : > { %s415_s30 = scalar_lea.vmem [#allocation15], %s2931_s7  ;;  %420 = sbr.rel (%p2009_p4) target bundleno = 165 (0xa5), region = 68 }
  0x84   : > { %v2673_v0 = vmov 0.0  }
  0x85   : > { %421 = vst [vmem:[#allocation2 + $0xb0] sm:$0xff] %v2673_v0  ;;  %422 = vst [vmem:[#allocation2 + $0x1b0] sm:$0xff] %v2673_v0 }
  0x86   : > { %423 = vst [vmem:[#allocation2 + $0xd8] sm:$0xff] %v2673_v0  ;;  %424 = vst [vmem:[#allocation2 + $0x18] sm:$0xff] %v2673_v0 }
  0x87   : > { %425 = vst [vmem:[#allocation2 + $0x50] sm:$0xff] %v2673_v0  ;;  %426 = vst [vmem:[#allocation2 + $0x168] sm:$0xff] %v2673_v0 }
  0x88   : > { %427 = vst [vmem:[#allocation2 + $0x130] sm:$0xff] %v2673_v0  ;;  %428 = vst [vmem:[#allocation2 + $0x48] sm:$0xff] %v2673_v0 }
  0x89   : > { %429 = vst [vmem:[#allocation2 + $0x180] sm:$0xff] %v2673_v0  ;;  %430 = vst [vmem:[#allocation2 + $0x110] sm:$0xff] %v2673_v0 }
  0x8a   : > { %431 = vst [vmem:[#allocation2 + $0x118] sm:$0xff] %v2673_v0  ;;  %432 = vst [vmem:[#allocation2 + $0x98] sm:$0xff] %v2673_v0 }
  0x8b   : > { %433 = vst [vmem:[#allocation2 + $0x120] sm:$0xff] %v2673_v0  ;;  %434 = vst [vmem:[#allocation2 + $0x150] sm:$0xff] %v2673_v0 }
  0x8c   : > { %435 = vst [vmem:[#allocation2 + $0x108] sm:$0xff] %v2673_v0  ;;  %436 = vst [vmem:[#allocation2 + $0x60] sm:$0xff] %v2673_v0 }
  0x8d   : > { %437 = vst [vmem:[#allocation2 + $0xe0] sm:$0xff] %v2673_v0  ;;  %438 = vst [vmem:[#allocation2 + $0x188] sm:$0xff] %v2673_v0 }
  0x8e   : > { %439 = vst [vmem:[#allocation2 + $0x138] sm:$0xff] %v2673_v0  ;;  %440 = vst [vmem:[#allocation2 + $0x140] sm:$0xff] %v2673_v0 }
  0x8f   : > { %441 = vst [vmem:[#allocation2 + $0x80] sm:$0xff] %v2673_v0  ;;  %442 = vst [vmem:[#allocation2 + $0x1a8] sm:$0xff] %v2673_v0 }
  0x90   : > { %443 = vst [vmem:[#allocation2 + $0x1b8] sm:$0xff] %v2673_v0  ;;  %444 = vst [vmem:[#allocation2 + $0x28] sm:$0xff] %v2673_v0 }
  0x91   : > { %445 = vst [vmem:[#allocation2 + $0x1e8] sm:$0xff] %v2673_v0  ;;  %446 = vst [vmem:[#allocation2 + $0xf8] sm:$0xff] %v2673_v0 }
  0x92   : > { %447 = vst [vmem:[#allocation2 + $0x160] sm:$0xff] %v2673_v0  ;;  %448 = vst [vmem:[#allocation2 + $0x30] sm:$0xff] %v2673_v0 }
  0x93   : > { %449 = vst [vmem:[#allocation2 + $0x1e0] sm:$0xff] %v2673_v0  ;;  %450 = vst [vmem:[#allocation2] sm:$0xff] %v2673_v0 }
  0x94   : > { %451 = vst [vmem:[#allocation2 + $0xf0] sm:$0xff] %v2673_v0  ;;  %452 = vst [vmem:[#allocation2 + $0x8] sm:$0xff] %v2673_v0 }
  0x95   : > { %453 = vst [vmem:[#allocation2 + $0x148] sm:$0xff] %v2673_v0  ;;  %454 = vst [vmem:[#allocation2 + $0x1d0] sm:$0xff] %v2673_v0 }
  0x96   : > { %455 = vst [vmem:[#allocation2 + $0x100] sm:$0xff] %v2673_v0  ;;  %456 = vst [vmem:[#allocation2 + $0xc8] sm:$0xff] %v2673_v0 }
  0x97   : > { %457 = vst [vmem:[#allocation2 + $0x40] sm:$0xff] %v2673_v0  ;;  %458 = vst [vmem:[#allocation2 + $0x1f8] sm:$0xff] %v2673_v0 }
  0x98   : > { %459 = vst [vmem:[#allocation2 + $0x20] sm:$0xff] %v2673_v0  ;;  %460 = vst [vmem:[#allocation2 + $0x128] sm:$0xff] %v2673_v0 }
  0x99   : > { %461 = vst [vmem:[#allocation2 + $0x1a0] sm:$0xff] %v2673_v0  ;;  %462 = vst [vmem:[#allocation2 + $0x1f0] sm:$0xff] %v2673_v0 }
  0x9a   : > { %463 = vst [vmem:[#allocation2 + $0xe8] sm:$0xff] %v2673_v0  ;;  %464 = vst [vmem:[#allocation2 + $0x78] sm:$0xff] %v2673_v0 }
  0x9b   : > { %465 = vst [vmem:[#allocation2 + $0x70] sm:$0xff] %v2673_v0  ;;  %466 = vst [vmem:[#allocation2 + $0x90] sm:$0xff] %v2673_v0 }
  0x9c   : > { %467 = vst [vmem:[#allocation2 + $0x1d8] sm:$0xff] %v2673_v0  ;;  %468 = vst [vmem:[#allocation2 + $0xd0] sm:$0xff] %v2673_v0 }
  0x9d   : > { %469 = vst [vmem:[#allocation2 + $0xb8] sm:$0xff] %v2673_v0  ;;  %470 = vst [vmem:[#allocation2 + $0x88] sm:$0xff] %v2673_v0 }
  0x9e   : > { %471 = vst [vmem:[#allocation2 + $0xa8] sm:$0xff] %v2673_v0  ;;  %472 = vst [vmem:[#allocation2 + $0x1c8] sm:$0xff] %v2673_v0 }
  0x9f   : > { %473 = vst [vmem:[#allocation2 + $0x170] sm:$0xff] %v2673_v0  ;;  %474 = vst [vmem:[#allocation2 + $0x178] sm:$0xff] %v2673_v0 }
  0xa0   : > { %475 = vst [vmem:[#allocation2 + $0x68] sm:$0xff] %v2673_v0  ;;  %476 = vst [vmem:[#allocation2 + $0x190] sm:$0xff] %v2673_v0 }
  0xa1   : > { %477 = vst [vmem:[#allocation2 + $0x198] sm:$0xff] %v2673_v0  ;;  %478 = vst [vmem:[#allocation2 + $0x38] sm:$0xff] %v2673_v0 }
  0xa2   : > { %479 = vst [vmem:[#allocation2 + $0xc0] sm:$0xff] %v2673_v0  ;;  %480 = vst [vmem:[#allocation2 + $0x1c0] sm:$0xff] %v2673_v0 }
  0xa3   : > { %481 = vst [vmem:[#allocation2 + $0x158] sm:$0xff] %v2673_v0  ;;  %482 = vst [vmem:[#allocation2 + $0x10] sm:$0xff] %v2673_v0 }
  0xa4   : > { %483 = vst [vmem:[#allocation2 + $0x58] sm:$0xff] %v2673_v0  ;;  %484 = vst [vmem:[#allocation2 + $0xa0] sm:$0xff] %v2673_v0 }
  0xa5 PF: > { %v485_v1 = vld [vmem:[%s2914_s6] sm:$0xff]  ;;  %v549_v2 = vld [vmem:[#allocation2 + $0xb0] sm:$0xff]  ;;  %v486_v3 = vld [vmem:[%s2914_s6 + $0x8] sm:$0xff]  ;;  %p2010_p8 = scmp.ne.s32.totalorder %s2647_s11, 1 }
  0xa6   : > { %v613_v4 = vadd.f32 %v549_v2, %v485_v1  ;;  %v550_v5 = vld [vmem:[#allocation2 + $0x1b0] sm:$0xff]  ;;  %v551_v7 = vld [vmem:[#allocation2 + $0xd8] sm:$0xff]  ;;  %v489_v12 = vld [vmem:[%s2914_s6 + $0x20] sm:$0xff]  ;;  %s3489_s8 = sld [smem:[#allocation30_spill]] (!%p2010_p8) }
  0xa7   : > { %v487_v6 = vld [vmem:[%s2914_s6 + $0x10] sm:$0xff]  ;;  %v614_v8 = vadd.f32 %v550_v5, %v486_v3  ;;  %v488_v10 = vld [vmem:[%s2914_s6 + $0x18] sm:$0xff]  ;;  %v490_v15 = vld [vmem:[%s2914_s6 + $0x28] sm:$0xff] }
  0xa8   : > { %v615_v9 = vadd.f32 %v551_v7, %v487_v6  ;;  %v552_v11 = vld [vmem:[#allocation2 + $0x18] sm:$0xff]  ;;  %677 = vst [vmem:[#allocation2 + $0xb0] sm:$0xff] %v613_v4  ;;  %v553_v14 = vld [vmem:[#allocation2 + $0x50] sm:$0xff]  ;;  %v554_v16 = vld [vmem:[#allocation2 + $0x168] sm:$0xff] }
  0xa9   : > { %v616_v13 = vadd.f32 %v552_v11, %v488_v10  ;;  %678 = vst [vmem:[#allocation2 + $0x1b0] sm:$0xff] %v614_v8  ;;  %v617_v17 = vadd.f32 %v553_v14, %v489_v12  ;;  %v618_v18 = vadd.f32 %v554_v16, %v490_v15  ;;  %v491_v19 = vld [vmem:[%s2914_s6 + $0x30] sm:$0xff]  ;;  %v492_v21 = vld [vmem:[%s2914_s6 + $0x38] sm:$0xff]  ;;  %v556_v23 = vld [vmem:[#allocation2 + $0x48] sm:$0xff] }
  0xaa   : > { %679 = vst [vmem:[#allocation2 + $0xd8] sm:$0xff] %v615_v9  ;;  %v555_v20 = vld [vmem:[#allocation2 + $0x130] sm:$0xff]  ;;  %v493_v24 = vld [vmem:[%s2914_s6 + $0x40] sm:$0xff]  ;;  %v620_v26 = vadd.f32 %v556_v23, %v492_v21  ;;  %v494_v28 = vld [vmem:[%s2914_s6 + $0x48] sm:$0xff] }
  0xab   : > { %680 = vst [vmem:[#allocation2 + $0x18] sm:$0xff] %v616_v13  ;;  %v619_v22 = vadd.f32 %v555_v20, %v491_v19  ;;  %v557_v25 = vld [vmem:[#allocation2 + $0x180] sm:$0xff]  ;;  %681 = vst [vmem:[#allocation2 + $0x50] sm:$0xff] %v617_v17  ;;  %v558_v29 = vld [vmem:[#allocation2 + $0x110] sm:$0xff] }
  0xac   : > { %682 = vst [vmem:[#allocation2 + $0x168] sm:$0xff] %v618_v18  ;;  %v621_v27 = vadd.f32 %v557_v25, %v493_v24  ;;  %v495_v30 = vld [vmem:[%s2914_s6 + $0x50] sm:$0xff]  ;;  %v622_v31 = vadd.f32 %v558_v29, %v494_v28  ;;  %v559_v32 = vld [vmem:[#allocation2 + $0x118] sm:$0xff]  ;;  %684 = vst [vmem:[#allocation2 + $0x48] sm:$0xff] %v620_v26 }
  0xad   : > { %683 = vst [vmem:[#allocation2 + $0x130] sm:$0xff] %v619_v22  ;;  %v496_v33 = vld [vmem:[%s2914_s6 + $0x58] sm:$0xff]  ;;  %v623_v35 = vadd.f32 %v559_v32, %v495_v30  ;;  %v497_v37 = vld [vmem:[%s2914_s6 + $0x60] sm:$0xff]  ;;  %v498_v39 = vld [vmem:[%s2914_s6 + $0x68] sm:$0xff] }
  0xae   : > { %v560_v34 = vld [vmem:[#allocation2 + $0x98] sm:$0xff]  ;;  %685 = vst [vmem:[#allocation2 + $0x180] sm:$0xff] %v621_v27  ;;  %v561_v38 = vld [vmem:[#allocation2 + $0x120] sm:$0xff]  ;;  %686 = vst [vmem:[#allocation2 + $0x110] sm:$0xff] %v622_v31 }
  0xaf   : > { %v624_v36 = vadd.f32 %v560_v34, %v496_v33  ;;  %v625_v40 = vadd.f32 %v561_v38, %v497_v37  ;;  %v562_v41 = vld [vmem:[#allocation2 + $0x150] sm:$0xff]  ;;  %v563_v43 = vld [vmem:[#allocation2 + $0x108] sm:$0xff]  ;;  %687 = vst [vmem:[#allocation2 + $0x118] sm:$0xff] %v623_v35  ;;  %v500_v46 = vld [vmem:[%s2914_s6 + $0x78] sm:$0xff] }
  0xb0   : > { %v499_v42 = vld [vmem:[%s2914_s6 + $0x70] sm:$0xff]  ;;  %v626_v44 = vadd.f32 %v562_v41, %v498_v39  ;;  %v564_v47 = vld [vmem:[#allocation2 + $0x60] sm:$0xff]  ;;  %v502_v51 = vld [vmem:[%s2914_s6 + $0x88] sm:$0xff] }
  0xb1   : > { %688 = vst [vmem:[#allocation2 + $0x98] sm:$0xff] %v624_v36  ;;  %v627_v45 = vadd.f32 %v563_v43, %v499_v42  ;;  %v501_v48 = vld [vmem:[%s2914_s6 + $0x80] sm:$0xff]  ;;  %689 = vst [vmem:[#allocation2 + $0x120] sm:$0xff] %v625_v40  ;;  %v628_v49 = vadd.f32 %v564_v47, %v500_v46  ;;  %v566_v52 = vld [vmem:[#allocation2 + $0x188] sm:$0xff] }
  0xb2   : > { %v565_v50 = vld [vmem:[#allocation2 + $0xe0] sm:$0xff]  ;;  %690 = vst [vmem:[#allocation2 + $0x150] sm:$0xff] %v626_v44  ;;  %v630_v54 = vadd.f32 %v566_v52, %v502_v51  ;;  %v503_v55 = vld [vmem:[%s2914_s6 + $0x90] sm:$0xff]  ;;  %v567_v56 = vld [vmem:[#allocation2 + $0x138] sm:$0xff] }
  0xb3   : > { %691 = vst [vmem:[#allocation2 + $0x108] sm:$0xff] %v627_v45  ;;  %v629_v53 = vadd.f32 %v565_v50, %v501_v48  ;;  %v504_v57 = vld [vmem:[%s2914_s6 + $0x98] sm:$0xff]  ;;  %692 = vst [vmem:[#allocation2 + $0x60] sm:$0xff] %v628_v49  ;;  %v631_v58 = vadd.f32 %v567_v56, %v503_v55  ;;  %v568_v59 = vld [vmem:[#allocation2 + $0x140] sm:$0xff] }
  0xb4   : > { %v505_v60 = vld [vmem:[%s2914_s6 + $0xa0] sm:$0xff]  ;;  %694 = vst [vmem:[#allocation2 + $0x188] sm:$0xff] %v630_v54  ;;  %v632_v62 = vadd.f32 %v568_v59, %v504_v57  ;;  %v506_v0 = vld [vmem:[%s2914_s6 + $0xa8] sm:$0xff]  ;;  %v507_v2 = vld [vmem:[%s2914_s6 + $0xb0] sm:$0xff] }
  0xb5   : > { %v569_v61 = vld [vmem:[#allocation2 + $0x80] sm:$0xff]  ;;  %693 = vst [vmem:[#allocation2 + $0xe0] sm:$0xff] %v629_v53  ;;  %v570_v1 = vld [vmem:[#allocation2 + $0x1a8] sm:$0xff]  ;;  %695 = vst [vmem:[#allocation2 + $0x138] sm:$0xff] %v631_v58 }
  0xb6   : > { %v633_v63 = vadd.f32 %v569_v61, %v505_v60  ;;  %v634_v3 = vadd.f32 %v570_v1, %v506_v0  ;;  %v571_v4 = vld [vmem:[#allocation2 + $0x1b8] sm:$0xff]  ;;  %v572_v6 = vld [vmem:[#allocation2 + $0x28] sm:$0xff]  ;;  %696 = vst [vmem:[#allocation2 + $0x140] sm:$0xff] %v632_v62  ;;  %v509_v9 = vld [vmem:[%s2914_s6 + $0xc0] sm:$0xff] }
  0xb7   : > { %v508_v5 = vld [vmem:[%s2914_s6 + $0xb8] sm:$0xff]  ;;  %v635_v7 = vadd.f32 %v571_v4, %v507_v2  ;;  %v573_v10 = vld [vmem:[#allocation2 + $0x1e8] sm:$0xff]  ;;  %v511_v14 = vld [vmem:[%s2914_s6 + $0xd0] sm:$0xff] }
  0xb8   : > { %697 = vst [vmem:[#allocation2 + $0x80] sm:$0xff] %v633_v63  ;;  %v636_v8 = vadd.f32 %v572_v6, %v508_v5  ;;  %v510_v11 = vld [vmem:[%s2914_s6 + $0xc8] sm:$0xff]  ;;  %698 = vst [vmem:[#allocation2 + $0x1a8] sm:$0xff] %v634_v3  ;;  %v637_v12 = vadd.f32 %v573_v10, %v509_v9  ;;  %v574_v13 = vld [vmem:[#allocation2 + $0xf8] sm:$0xff] }
  0xb9   : > { %v575_v15 = vld [vmem:[#allocation2 + $0x160] sm:$0xff]  ;;  %699 = vst [vmem:[#allocation2 + $0x1b8] sm:$0xff] %v635_v7  ;;  %v638_v16 = vadd.f32 %v574_v13, %v510_v11  ;;  %v512_v18 = vld [vmem:[%s2914_s6 + $0xd8] sm:$0xff]  ;;  %v576_v19 = vld [vmem:[#allocation2 + $0x30] sm:$0xff] }
  0xba   : > { %700 = vst [vmem:[#allocation2 + $0x28] sm:$0xff] %v636_v8  ;;  %v639_v17 = vadd.f32 %v575_v15, %v511_v14  ;;  %v513_v20 = vld [vmem:[%s2914_s6 + $0xe0] sm:$0xff]  ;;  %701 = vst [vmem:[#allocation2 + $0x1e8] sm:$0xff] %v637_v12  ;;  %v640_v21 = vadd.f32 %v576_v19, %v512_v18  ;;  %v514_v23 = vld [vmem:[%s2914_s6 + $0xe8] sm:$0xff] }
  0xbb   : > { %v577_v22 = vld [vmem:[#allocation2 + $0x1e0] sm:$0xff]  ;;  %702 = vst [vmem:[#allocation2 + $0xf8] sm:$0xff] %v638_v16  ;;  %v515_v27 = vld [vmem:[%s2914_s6 + $0xf0] sm:$0xff]  ;;  %v516_v29 = vld [vmem:[%s2914_s6 + $0xf8] sm:$0xff] }
  0xbc   : > { %v578_v24 = vld [vmem:[#allocation2] sm:$0xff]  ;;  %703 = vst [vmem:[#allocation2 + $0x160] sm:$0xff] %v639_v17  ;;  %v641_v25 = vadd.f32 %v577_v22, %v513_v20  ;;  %v579_v28 = vld [vmem:[#allocation2 + $0xf0] sm:$0xff]  ;;  %704 = vst [vmem:[#allocation2 + $0x30] sm:$0xff] %v640_v21 }
  0xbd   : > { %v642_v26 = vadd.f32 %v578_v24, %v514_v23  ;;  %v643_v30 = vadd.f32 %v579_v28, %v515_v27  ;;  %v580_v31 = vld [vmem:[#allocation2 + $0x8] sm:$0xff]  ;;  %v517_v32 = vld [vmem:[%s2914_s6 + $0x100] sm:$0xff]  ;;  %v582_v37 = vld [vmem:[#allocation2 + $0x1d0] sm:$0xff] }
  0xbe   : > { %v581_v33 = vld [vmem:[#allocation2 + $0x148] sm:$0xff]  ;;  %705 = vst [vmem:[#allocation2 + $0x1e0] sm:$0xff] %v641_v25  ;;  %v644_v34 = vadd.f32 %v580_v31, %v516_v29  ;;  %v519_v38 = vld [vmem:[%s2914_s6 + $0x110] sm:$0xff]  ;;  %v583_v40 = vld [vmem:[#allocation2 + $0x100] sm:$0xff] }
  0xbf   : > { %706 = vst [vmem:[#allocation2] sm:$0xff] %v642_v26  ;;  %v645_v35 = vadd.f32 %v581_v33, %v517_v32  ;;  %v518_v36 = vld [vmem:[%s2914_s6 + $0x108] sm:$0xff]  ;;  %707 = vst [vmem:[#allocation2 + $0xf0] sm:$0xff] %v643_v30  ;;  %v520_v41 = vld [vmem:[%s2914_s6 + $0x118] sm:$0xff]  ;;  %v647_v43 = vadd.f32 %v583_v40, %v519_v38 }
  0xc0   : > { %v646_v39 = vadd.f32 %v582_v37, %v518_v36  ;;  %v584_v42 = vld [vmem:[#allocation2 + $0xc8] sm:$0xff]  ;;  %708 = vst [vmem:[#allocation2 + $0x8] sm:$0xff] %v644_v34  ;;  %v521_v45 = vld [vmem:[%s2914_s6 + $0x120] sm:$0xff]  ;;  %v586_v49 = vld [vmem:[#allocation2 + $0x1f8] sm:$0xff] }
  0xc1   : > { %709 = vst [vmem:[#allocation2 + $0x148] sm:$0xff] %v645_v35  ;;  %v648_v44 = vadd.f32 %v584_v42, %v520_v41  ;;  %v585_v46 = vld [vmem:[#allocation2 + $0x40] sm:$0xff]  ;;  %v522_v47 = vld [vmem:[%s2914_s6 + $0x128] sm:$0xff]  ;;  %v523_v50 = vld [vmem:[%s2914_s6 + $0x130] sm:$0xff] }
  0xc2   : > { %710 = vst [vmem:[#allocation2 + $0x1d0] sm:$0xff] %v646_v39  ;;  %v649_v48 = vadd.f32 %v585_v46, %v521_v45  ;;  %v587_v51 = vld [vmem:[#allocation2 + $0x20] sm:$0xff]  ;;  %711 = vst [vmem:[#allocation2 + $0x100] sm:$0xff] %v647_v43  ;;  %v650_v52 = vadd.f32 %v586_v49, %v522_v47  ;;  %v524_v54 = vld [vmem:[%s2914_s6 + $0x138] sm:$0xff] }
  0xc3   : > { %712 = vst [vmem:[#allocation2 + $0xc8] sm:$0xff] %v648_v44  ;;  %v651_v53 = vadd.f32 %v587_v51, %v523_v50  ;;  %v588_v55 = vld [vmem:[#allocation2 + $0x128] sm:$0xff]  ;;  %v525_v56 = vld [vmem:[%s2914_s6 + $0x140] sm:$0xff]  ;;  %v590_v60 = vld [vmem:[#allocation2 + $0x1f0] sm:$0xff] }
  0xc4   : > { %713 = vst [vmem:[#allocation2 + $0x40] sm:$0xff] %v649_v48  ;;  %v652_v57 = vadd.f32 %v588_v55, %v524_v54  ;;  %v589_v58 = vld [vmem:[#allocation2 + $0x1a0] sm:$0xff]  ;;  %v526_v59 = vld [vmem:[%s2914_s6 + $0x148] sm:$0xff]  ;;  %714 = vst [vmem:[#allocation2 + $0x1f8] sm:$0xff] %v650_v52 }
  0xc5   : > { %715 = vst [vmem:[#allocation2 + $0x20] sm:$0xff] %v651_v53  ;;  %v653_v61 = vadd.f32 %v589_v58, %v525_v56  ;;  %v654_v62 = vadd.f32 %v590_v60, %v526_v59  ;;  %v527_v63 = vld [vmem:[%s2914_s6 + $0x150] sm:$0xff]  ;;  %v591_v0 = vld [vmem:[#allocation2 + $0xe8] sm:$0xff]  ;;  %v528_v1 = vld [vmem:[%s2914_s6 + $0x158] sm:$0xff] }
  0xc6   : > { %716 = vst [vmem:[#allocation2 + $0x128] sm:$0xff] %v652_v57  ;;  %v655_v2 = vadd.f32 %v591_v0, %v527_v63  ;;  %v592_v3 = vld [vmem:[#allocation2 + $0x78] sm:$0xff]  ;;  %v529_v4 = vld [vmem:[%s2914_s6 + $0x160] sm:$0xff]  ;;  %v593_v5 = vld [vmem:[#allocation2 + $0x70] sm:$0xff] }
  0xc7   : > { %717 = vst [vmem:[#allocation2 + $0x1a0] sm:$0xff] %v653_v61  ;;  %718 = vst [vmem:[#allocation2 + $0x1f0] sm:$0xff] %v654_v62  ;;  %v656_v6 = vadd.f32 %v592_v3, %v528_v1  ;;  %v657_v7 = vadd.f32 %v593_v5, %v529_v4  ;;  %v530_v8 = vld [vmem:[%s2914_s6 + $0x168] sm:$0xff]  ;;  %v594_v9 = vld [vmem:[#allocation2 + $0x90] sm:$0xff] }
  0xc8   : > { %v531_v10 = vld [vmem:[%s2914_s6 + $0x170] sm:$0xff]  ;;  %719 = vst [vmem:[#allocation2 + $0xe8] sm:$0xff] %v655_v2  ;;  %v658_v11 = vadd.f32 %v594_v9, %v530_v8  ;;  %v595_v12 = vld [vmem:[#allocation2 + $0x1d8] sm:$0xff]  ;;  %v533_v17 = vld [vmem:[%s2914_s6 + $0x180] sm:$0xff] }
  0xc9   : > { %v532_v13 = vld [vmem:[%s2914_s6 + $0x178] sm:$0xff]  ;;  %v596_v14 = vld [vmem:[#allocation2 + $0xd0] sm:$0xff]  ;;  %720 = vst [vmem:[#allocation2 + $0x78] sm:$0xff] %v656_v6  ;;  %721 = vst [vmem:[#allocation2 + $0x70] sm:$0xff] %v657_v7  ;;  %v659_v15 = vadd.f32 %v595_v12, %v531_v10 }
  0xca   : > { %v660_v16 = vadd.f32 %v596_v14, %v532_v13  ;;  %v597_v18 = vld [vmem:[#allocation2 + $0xb8] sm:$0xff]  ;;  %v534_v19 = vld [vmem:[%s2914_s6 + $0x188] sm:$0xff]  ;;  %722 = vst [vmem:[#allocation2 + $0x90] sm:$0xff] %v658_v11  ;;  %v535_v22 = vld [vmem:[%s2914_s6 + $0x190] sm:$0xff] }
  0xcb   : > { %v661_v20 = vadd.f32 %v597_v18, %v533_v17  ;;  %v598_v21 = vld [vmem:[#allocation2 + $0x88] sm:$0xff]  ;;  %723 = vst [vmem:[#allocation2 + $0x1d8] sm:$0xff] %v659_v15  ;;  %v536_v26 = vld [vmem:[%s2914_s6 + $0x198] sm:$0xff]  ;;  %v537_v28 = vld [vmem:[%s2914_s6 + $0x1a0] sm:$0xff] }
  0xcc   : > { %v599_v23 = vld [vmem:[#allocation2 + $0xa8] sm:$0xff]  ;;  %724 = vst [vmem:[#allocation2 + $0xd0] sm:$0xff] %v660_v16  ;;  %v662_v24 = vadd.f32 %v598_v21, %v534_v19  ;;  %v601_v30 = vld [vmem:[#allocation2 + $0x170] sm:$0xff]  ;;  %v602_v32 = vld [vmem:[#allocation2 + $0x178] sm:$0xff] }
  0xcd   : > { %v663_v25 = vadd.f32 %v599_v23, %v535_v22  ;;  %v600_v27 = vld [vmem:[#allocation2 + $0x1c8] sm:$0xff]  ;;  %725 = vst [vmem:[#allocation2 + $0xb8] sm:$0xff] %v661_v20  ;;  %v665_v33 = vadd.f32 %v601_v30, %v537_v28  ;;  %v539_v35 = vld [vmem:[%s2914_s6 + $0x1b0] sm:$0xff]  ;;  %v540_v37 = vld [vmem:[%s2914_s6 + $0x1b8] sm:$0xff] }
  0xce   : > { %v664_v29 = vadd.f32 %v600_v27, %v536_v26  ;;  %v538_v31 = vld [vmem:[%s2914_s6 + $0x1a8] sm:$0xff]  ;;  %726 = vst [vmem:[#allocation2 + $0x88] sm:$0xff] %v662_v24  ;;  %v604_v39 = vld [vmem:[#allocation2 + $0x190] sm:$0xff]  ;;  %v541_v40 = vld [vmem:[%s2914_s6 + $0x1c0] sm:$0xff] }
  0xcf   : > { %727 = vst [vmem:[#allocation2 + $0xa8] sm:$0xff] %v663_v25  ;;  %v666_v34 = vadd.f32 %v602_v32, %v538_v31  ;;  %v603_v36 = vld [vmem:[#allocation2 + $0x68] sm:$0xff]  ;;  %v605_v41 = vld [vmem:[#allocation2 + $0x198] sm:$0xff]  ;;  %729 = vst [vmem:[#allocation2 + $0x170] sm:$0xff] %v665_v33  ;;  %v668_v42 = vadd.f32 %v604_v39, %v540_v37 }
  0xd0   : > { %728 = vst [vmem:[#allocation2 + $0x1c8] sm:$0xff] %v664_v29  ;;  %v667_v38 = vadd.f32 %v603_v36, %v539_v35  ;;  %v669_v43 = vadd.f32 %v605_v41, %v541_v40  ;;  %v542_v44 = vld [vmem:[%s2914_s6 + $0x1c8] sm:$0xff]  ;;  %v606_v45 = vld [vmem:[#allocation2 + $0x38] sm:$0xff]  ;;  %v543_v46 = vld [vmem:[%s2914_s6 + $0x1d0] sm:$0xff] }
  0xd1   : > { %730 = vst [vmem:[#allocation2 + $0x178] sm:$0xff] %v666_v34  ;;  %v670_v47 = vadd.f32 %v606_v45, %v542_v44  ;;  %v607_v48 = vld [vmem:[#allocation2 + $0xc0] sm:$0xff]  ;;  %v544_v49 = vld [vmem:[%s2914_s6 + $0x1d8] sm:$0xff]  ;;  %732 = vst [vmem:[#allocation2 + $0x190] sm:$0xff] %v668_v42 }
  0xd2   : > { %731 = vst [vmem:[#allocation2 + $0x68] sm:$0xff] %v667_v38  ;;  %v608_v50 = vld [vmem:[#allocation2 + $0x1c0] sm:$0xff]  ;;  %733 = vst [vmem:[#allocation2 + $0x198] sm:$0xff] %v669_v43  ;;  %v671_v51 = vadd.f32 %v607_v48, %v543_v46  ;;  %v609_v54 = vld [vmem:[#allocation2 + $0x158] sm:$0xff] }
  0xd3   : > { %v672_v52 = vadd.f32 %v608_v50, %v544_v49  ;;  %v545_v53 = vld [vmem:[%s2914_s6 + $0x1e0] sm:$0xff]  ;;  %v546_v55 = vld [vmem:[%s2914_s6 + $0x1e8] sm:$0xff]  ;;  %734 = vst [vmem:[#allocation2 + $0x38] sm:$0xff] %v670_v47  ;;  %v610_v57 = vld [vmem:[#allocation2 + $0x10] sm:$0xff] }
  0xd4   : > { %v673_v56 = vadd.f32 %v609_v54, %v545_v53  ;;  %v547_v58 = vld [vmem:[%s2914_s6 + $0x1f0] sm:$0xff]  ;;  %v611_v59 = vld [vmem:[#allocation2 + $0x58] sm:$0xff]  ;;  %735 = vst [vmem:[#allocation2 + $0xc0] sm:$0xff] %v671_v51  ;;  %v674_v60 = vadd.f32 %v610_v57, %v546_v55  ;;  %v612_v63 = vld [vmem:[#allocation2 + $0xa0] sm:$0xff]  ;;  %744 = sbr.rel (%p2010_p8) target bundleno = 1105 (0x451), region = 72 }
  0xd5   : > { %736 = vst [vmem:[#allocation2 + $0x1c0] sm:$0xff] %v672_v52  ;;  %v675_v61 = vadd.f32 %v611_v59, %v547_v58  ;;  %v548_v62 = vld [vmem:[%s2914_s6 + $0x1f8] sm:$0xff] }
  0xd6   : > { %737 = vst [vmem:[#allocation2 + $0x158] sm:$0xff] %v673_v56  ;;  %v676_v0 = vadd.f32 %v612_v63, %v548_v62  ;;  %738 = vst [vmem:[#allocation2 + $0x10] sm:$0xff] %v674_v60 }
  0xd7   : > { %739 = vst [vmem:[#allocation2 + $0x58] sm:$0xff] %v675_v61 }
  0xd8   : > { %740 = vst [vmem:[#allocation2 + $0xa0] sm:$0xff] %v676_v0 }
  0xd9   : > { %v753_v1 = vld [vmem:[#allocation2 + $0x180] sm:$0xff]  ;;  %v745_v2 = vld [vmem:[#allocation2 + $0xb0] sm:$0xff]  ;;  %v755_v5 = vld [vmem:[#allocation2 + $0x118] sm:$0xff]  ;;  %vm2675_vm0 = vmmov 0   ;;  %vm1084_vm1 = vcmask 130112   ;;  %vm1091_vm2 = vcmask 195712  }
  0xda   : > { %825 = vadd.xlane.f32.xlu1 %v753_v1  ;;  %809 = vadd.xlane.f32.xlu0 %v745_v2  ;;  %v754_v3 = vld [vmem:[#allocation2 + $0x110] sm:$0xff]  ;;  %v747_v6 = vld [vmem:[#allocation2 + $0xd8] sm:$0xff]  ;;  %v762_v7 = vld [vmem:[#allocation2 + $0x188] sm:$0xff]  ;;  %v2674_v1 = vmov 0.0   ;;  %vm1098_vm3 = vcmask 261312   ;;  %vm1105_vm4 = vcmask 326912  }
  0xdb   : > { %v746_v4 = vld [vmem:[#allocation2 + $0x1b0] sm:$0xff]  ;;  %v761_v8 = vld [vmem:[#allocation2 + $0xe0] sm:$0xff]  ;;  %v756_v9 = vld [vmem:[#allocation2 + $0x98] sm:$0xff]  ;;  %2076 = vmatprep.subr.mxu1 %v2674_v1  ;;  %2130 = vmatprep.subr.mxu0 %v2674_v1  ;;  %vm1112_vm5 = vcmask 392512   ;;  %vm1119_vm6 = vcmask 458112   ;;  %vm1126_vm7 = vcmask 523712  }
  0xdc   : > { %v748_v10 = vld [vmem:[#allocation2 + $0x18] sm:$0xff]  ;;  %v769_v11 = vld [vmem:[#allocation2 + $0x1e8] sm:$0xff]  ;;  %v749_v13 = vld [vmem:[#allocation2 + $0x50] sm:$0xff]  ;;  %2092 = vmatprep.mubr.msk.f32.mxu1 %vm2675_vm0, %v2674_v1  ;;  %2146 = vmatprep.mubr.msk.f32.mxu0 %vm2675_vm0, %v2674_v1  ;;  %vm1401_vm8 = vcmask 1041409   ;;  %vm1403_vm9 = vcmask 1042434   ;;  %vm1405_vm10 = vcmask 1043459  }
  0xdd   : > { %v763_v12 = vld [vmem:[#allocation2 + $0x138] sm:$0xff]  ;;  %v764_v15 = vld [vmem:[#allocation2 + $0x140] sm:$0xff]  ;;  %v777_v17 = vld [vmem:[#allocation2 + $0x148] sm:$0xff]  ;;  %vm1407_vm11 = vcmask 1044484   ;;  %vm1409_vm12 = vcmask 1045509   ;;  %vm1411_vm13 = vcmask 1046534  }
  0xde   : > { %827 = vadd.xlane.f32.xlu1 %v754_v3  ;;  %811 = vadd.xlane.f32.xlu0 %v746_v4  ;;  %v770_v14 = vld [vmem:[#allocation2 + $0xf8] sm:$0xff]  ;;  %v757_v16 = vld [vmem:[#allocation2 + $0x120] sm:$0xff]  ;;  %v750_v19 = vld [vmem:[#allocation2 + $0x168] sm:$0xff]  ;;  %vm1413_vm14 = vcmask 1047559   ;;  %vm1415_vm15 = vcmask 523264  }
  0xdf   : > { %v771_v18 = vld [vmem:[#allocation2 + $0x160] sm:$0xff]  ;;  %v778_v20 = vld [vmem:[#allocation2 + $0x1d0] sm:$0xff]  ;;  %v759_v27 = vld [vmem:[#allocation2 + $0x108] sm:$0xff] }
  0xe0   : > { %v765_v21 = vld [vmem:[#allocation2 + $0x80] sm:$0xff]  ;;  %v758_v22 = vld [vmem:[#allocation2 + $0x150] sm:$0xff]  ;;  %v766_v30 = vld [vmem:[#allocation2 + $0x1a8] sm:$0xff] }
  0xe1   : > { %v779_v23 = vld [vmem:[#allocation2 + $0x100] sm:$0xff]  ;;  %v772_v24 = vld [vmem:[#allocation2 + $0x30] sm:$0xff]  ;;  %v787_v31 = vld [vmem:[#allocation2 + $0xe8] sm:$0xff] }
  0xe2   : > { %829 = vadd.xlane.f32.xlu1 %v755_v5  ;;  %813 = vadd.xlane.f32.xlu0 %v747_v6  ;;  %v786_v25 = vld [vmem:[#allocation2 + $0x1f0] sm:$0xff]  ;;  %v785_v26 = vld [vmem:[#allocation2 + $0x1a0] sm:$0xff]  ;;  %v780_v32 = vld [vmem:[#allocation2 + $0xc8] sm:$0xff] }
  0xe3   : > { %v751_v28 = vld [vmem:[#allocation2 + $0x130] sm:$0xff]  ;;  %v773_v29 = vld [vmem:[#allocation2 + $0x1e0] sm:$0xff]  ;;  %v794_v33 = vld [vmem:[#allocation2 + $0x88] sm:$0xff] }
  0xe4   : > { %v793_v34 = vld [vmem:[#allocation2 + $0xb8] sm:$0xff]  ;;  %v760_v35 = vld [vmem:[#allocation2 + $0x60] sm:$0xff]  ;;  %v752_v36 = vld [vmem:[#allocation2 + $0x48] sm:$0xff] }
  0xe5   : > { %v774_v37 = vld [vmem:[#allocation2] sm:$0xff]  ;;  %v767_v38 = vld [vmem:[#allocation2 + $0x1b8] sm:$0xff]  ;;  %v795_v42 = vld [vmem:[#allocation2 + $0xa8] sm:$0xff] }
  0xe6   : > { %843 = vadd.xlane.f32.xlu1 %v762_v7  ;;  %841 = vadd.xlane.f32.xlu0 %v761_v8  ;;  %v788_v39 = vld [vmem:[#allocation2 + $0x78] sm:$0xff]  ;;  %v781_v40 = vld [vmem:[#allocation2 + $0x40] sm:$0xff]  ;;  %v768_v43 = vld [vmem:[#allocation2 + $0x28] sm:$0xff]  ;;  %v1073_v8 = vlaneseq }
  0xe7   : > { %v801_v41 = vld [vmem:[#allocation2 + $0x198] sm:$0xff]  ;;  %v775_v46 = vld [vmem:[#allocation2 + $0xf0] sm:$0xff]  ;;  %v796_v47 = vld [vmem:[#allocation2 + $0x1c8] sm:$0xff] }
  0xe8   : > { %v802_v44 = vld [vmem:[#allocation2 + $0x38] sm:$0xff]  ;;  %v789_v48 = vld [vmem:[#allocation2 + $0x70] sm:$0xff]  ;;  %v776_v49 = vld [vmem:[#allocation2 + $0x8] sm:$0xff] }
  0xe9   : > { %v782_v45 = vld [vmem:[#allocation2 + $0x1f8] sm:$0xff]  ;;  %v803_v50 = vld [vmem:[#allocation2 + $0xc0] sm:$0xff]  ;;  %v790_v51 = vld [vmem:[#allocation2 + $0x90] sm:$0xff] }
  0xea   : > { %831 = vadd.xlane.f32.xlu1 %v756_v9  ;;  %815 = vadd.xlane.f32.xlu0 %v748_v10  ;;  %v783_v52 = vld [vmem:[#allocation2 + $0x20] sm:$0xff]  ;;  %v797_v54 = vld [vmem:[#allocation2 + $0x170] sm:$0xff]  ;;  %v791_v55 = vld [vmem:[#allocation2 + $0x1d8] sm:$0xff] }
  0xeb   : > { %v804_v53 = vld [vmem:[#allocation2 + $0x1c0] sm:$0xff]  ;;  %v784_v56 = vld [vmem:[#allocation2 + $0x128] sm:$0xff]  ;;  %v805_v57 = vld [vmem:[#allocation2 + $0x158] sm:$0xff] }
  0xec   : > { %v798_v58 = vld [vmem:[#allocation2 + $0x178] sm:$0xff]  ;;  %v799_v59 = vld [vmem:[#allocation2 + $0x68] sm:$0xff]  ;;  %v792_v60 = vld [vmem:[#allocation2 + $0xd0] sm:$0xff] }
  0xed   : > { %v800_v61 = vld [vmem:[#allocation2 + $0x190] sm:$0xff]  ;;  %v807_v63 = vld [vmem:[#allocation2 + $0x58] sm:$0xff]  ;;  %v808_v0 = vld [vmem:[#allocation2 + $0xa0] sm:$0xff] }
  0xee   : > { %857 = vadd.xlane.f32.xlu1 %v769_v11  ;;  %845 = vadd.xlane.f32.xlu0 %v763_v12  ;;  %v806_v62 = vld [vmem:[#allocation2 + $0x10] sm:$0xff]  ;;  %v1008_v2 = vld [vmem:[#allocation6 + $0x38] sm:$0xff]  ;;  %v1006_v6 = vld [vmem:[#allocation6 + $0x28] sm:$0xff] }
  0xef   : > { %v1588_v3 = vld [vmem:[#allocation11 + $0x38] sm:$0xff]  ;;  %2077 = vmatpush3.msra.mxu1 %v1008_v2  ;;  %v1007_v4 = vld [vmem:[#allocation6 + $0x30] sm:$0xff]  ;;  %v1586_v7 = vld [vmem:[#allocation11 + $0x28] sm:$0xff] }
  0xf0   : > { %2131 = vmatpush3.msra.mxu0 %v1588_v3  ;;  %2078 = vmatprep.subr.mxu1 %v2674_v1  ;;  %v1587_v5 = vld [vmem:[#allocation11 + $0x30] sm:$0xff]  ;;  %v1005_v9 = vld [vmem:[#allocation6 + $0x20] sm:$0xff]  ;;  %v1004_v11 = vld [vmem:[#allocation6 + $0x18] sm:$0xff] }
  0xf1   : > { %2132 = vmatprep.subr.mxu0 %v2674_v1  ;;  %2079 = vmatpush3.msra.mxu1 %v1007_v4  ;;  %v1585_v10 = vld [vmem:[#allocation11 + $0x20] sm:$0xff]  ;;  %v1584_v12 = vld [vmem:[#allocation11 + $0x18] sm:$0xff] }
  0xf2   : > { %817 = vadd.xlane.f32.xlu1 %v749_v13  ;;  %859 = vadd.xlane.f32.xlu0 %v770_v14  ;;  %v3076_v13 = vand.u32 127, %v1073_v8  ;;  %v1003_v14 = vld [vmem:[#allocation6 + $0x10] sm:$0xff] }
  0xf3   : > { %2133 = vmatpush3.msra.mxu0 %v1587_v5  ;;  %2080 = vmatprep.subr.mxu1 %v2674_v1 }
  0xf4   : > { %2134 = vmatprep.subr.mxu0 %v2674_v1  ;;  %2081 = vmatpush3.msra.mxu1 %v1006_v6 }
  0xf5   : > { %2135 = vmatpush3.msra.mxu0 %v1586_v7  ;;  %2082 = vmatprep.subr.mxu1 %v2674_v1 }
  0xf6   : > { %847 = vadd.xlane.f32.xlu1 %v764_v15  ;;  %833 = vadd.xlane.f32.xlu0 %v757_v16  ;;  %v1583_v15 = vld [vmem:[#allocation11 + $0x10] sm:$0xff]  ;;  %v3080_v16 = vshrl.u32 %v1073_v8, 7 }
  0xf7   : > { %2136 = vmatprep.subr.mxu0 %v2674_v1  ;;  %2083 = vmatpush3.msra.mxu1 %v1005_v9 }
  0xf8   : > { %2137 = vmatpush3.msra.mxu0 %v1585_v10  ;;  %2084 = vmatprep.subr.mxu1 %v2674_v1 }
  0xf9   : > { %2138 = vmatprep.subr.mxu0 %v2674_v1  ;;  %2085 = vmatpush3.msra.mxu1 %v1004_v11 }
  0xfa   : > { %873 = vadd.xlane.f32.xlu1 %v777_v17  ;;  %861 = vadd.xlane.f32.xlu0 %v771_v18  ;;  %v1079_v17 = vadd.s32 4294967288, %v3076_v13 }
  0xfb   : > { %2139 = vmatpush3.msra.mxu0 %v1584_v12  ;;  %2086 = vmatprep.subr.mxu1 %v2674_v1 }
  0xfc   : > { %2140 = vmatprep.subr.mxu0 %v2674_v1  ;;  %2087 = vmatpush3.msra.mxu1 %v1003_v14 }
  0xfd   : > { %2141 = vmatpush3.msra.mxu0 %v1583_v15  ;;  %2088 = vmatprep.subr.mxu1 %v2674_v1 }
  0xfe   : > { %819 = vadd.xlane.f32.xlu1 %v750_v19  ;;  %875 = vadd.xlane.f32.xlu0 %v778_v20  ;;  %v1002_v20 = vld [vmem:[#allocation6 + $0x8] sm:$0xff] }
  0xff   : > { %2142 = vmatprep.subr.mxu0 %v2674_v1  ;;  %2089 = vmatpush3.msra.mxu1 %v1002_v20 }
 0x100   : > { %2090 = vmatprep.subr.mxu1 %v2674_v1 }
 0x102   : > { %849 = vadd.xlane.f32.xlu1 %v765_v21  ;;  %835 = vadd.xlane.f32.xlu0 %v758_v22  ;;  %v1582_v21 = vld [vmem:[#allocation11 + $0x8] sm:$0xff]  ;;  %v1001_v22 = vld [vmem:[#allocation6] sm:$0xff] }
 0x103   : > { %2143 = vmatpush3.msra.mxu0 %v1582_v21  ;;  %2091 = vmatpush3.msra.mxu1 %v1001_v22 }
 0x104   : > { %2144 = vmatprep.subr.mxu0 %v2674_v1  ;;  %2095 = vmatprep.subr.mxu1 %v2674_v1 }
 0x106   : > { %877 = vadd.xlane.f32.xlu1 %v779_v23  ;;  %863 = vadd.xlane.f32.xlu0 %v772_v24  ;;  %v1581_v23 = vld [vmem:[#allocation11] sm:$0xff]  ;;  %v1086_v24 = vadd.s32 4294967280, %v3076_v13 }
 0x107   : > { %2145 = vmatpush3.msra.mxu0 %v1581_v23 }
 0x108   : > { %2149 = vmatprep.subr.mxu0 %v2674_v1 }
 0x10a   : > { %891 = vadd.xlane.f32.xlu1 %v786_v25  ;;  %889 = vadd.xlane.f32.xlu0 %v785_v26  ;;  %v3090_v25 = vsub.s32 %v3076_v13, %v3080_v16 }
 0x10e   : > { %837 = vadd.xlane.f32.xlu1 %v759_v27  ;;  %821 = vadd.xlane.f32.xlu0 %v751_v28  ;;  %v3093_v28 = vsub.s32 %v1079_v17, %v3080_v16 }
 0x112   : > { %865 = vadd.xlane.f32.xlu1 %v773_v29  ;;  %851 = vadd.xlane.f32.xlu0 %v766_v30 }
 0x116   : > { %893 = vadd.xlane.f32.xlu1 %v787_v31  ;;  %879 = vadd.xlane.f32.xlu0 %v780_v32 }
 0x11a   : > { %907 = vadd.xlane.f32.xlu1 %v794_v33  ;;  %905 = vadd.xlane.f32.xlu0 %v793_v34  ;;  %v3102_v33 = vsub.s32 %v1086_v24, %v3080_v16 }
 0x11e   : > { %839 = vadd.xlane.f32.xlu1 %v760_v35  ;;  %823 = vadd.xlane.f32.xlu0 %v752_v36 }
 0x122   : > { %867 = vadd.xlane.f32.xlu1 %v774_v37  ;;  %853 = vadd.xlane.f32.xlu0 %v767_v38 }
 0x126   : > { %895 = vadd.xlane.f32.xlu1 %v788_v39  ;;  %881 = vadd.xlane.f32.xlu0 %v781_v40 }
 0x12a   : > { %921 = vadd.xlane.f32.xlu1 %v801_v41  ;;  %909 = vadd.xlane.f32.xlu0 %v795_v42 }
 0x12e   : > { %855 = vadd.xlane.f32.xlu1 %v768_v43  ;;  %923 = vadd.xlane.f32.xlu0 %v802_v44 }
 0x132   : > { %883 = vadd.xlane.f32.xlu1 %v782_v45  ;;  %869 = vadd.xlane.f32.xlu0 %v775_v46  ;;  %v1093_v46 = vadd.s32 4294967272, %v3076_v13 }
 0x136   : > { %911 = vadd.xlane.f32.xlu1 %v796_v47  ;;  %897 = vadd.xlane.f32.xlu0 %v789_v48 }
 0x13a   : > { %871 = vadd.xlane.f32.xlu1 %v776_v49  ;;  %925 = vadd.xlane.f32.xlu0 %v803_v50 }
 0x13e   : > { %899 = vadd.xlane.f32.xlu1 %v790_v51  ;;  %885 = vadd.xlane.f32.xlu0 %v783_v52 }
 0x142   : > { %927 = vadd.xlane.f32.xlu1 %v804_v53  ;;  %913 = vadd.xlane.f32.xlu0 %v797_v54 }
 0x146   : > { %901 = vadd.xlane.f32.xlu1 %v791_v55  ;;  %887 = vadd.xlane.f32.xlu0 %v784_v56  ;;  %v3118_v55 = vsub.s32 %v1093_v46, %v3080_v16 }
 0x14a   : > { %929 = vadd.xlane.f32.xlu1 %v805_v57  ;;  %915 = vadd.xlane.f32.xlu0 %v798_v58 }
 0x14e   : > { %917 = vadd.xlane.f32.xlu1 %v799_v59  ;;  %903 = vadd.xlane.f32.xlu0 %v792_v60 }
 0x152   : > { %919 = vadd.xlane.f32.xlu1 %v800_v61  ;;  %931 = vadd.xlane.f32.xlu0 %v806_v62 }
 0x156   : > { %933 = vadd.xlane.f32.xlu0 %v807_v63  ;;  %935 = vadd.xlane.f32.xlu1 %v808_v0  ;;  %v1100_v63 = vadd.s32 4294967264, %v3076_v13 }
 0x158   : > { %v3128_v8 = vsub.s32 %v1100_v63, %v3080_v16 }
 0x163   : > { %v826_v18 = vpop.xlane.xlu1 %825  ;;  %v810_v19 = vpop.xlane.xlu0 %809 }
 0x164   : > { %v945_v26 = vmul.f32 0.00390625, %v826_v18  ;;  %v937_v27 = vmul.f32 0.00390625, %v810_v19 }
 0x166   : > { %v1131_v34 = vrot.slane %v945_v26, %v3090_v25  ;;  %v1078_v35 = vrot.slane %v937_v27, %v3090_v25 }
 0x167   : > { %v828_v29 = vpop.xlane.xlu1 %827  ;;  %v812_v30 = vpop.xlane.xlu0 %811 }
 0x168   : > { %v946_v31 = vmul.f32 0.00390625, %v828_v29  ;;  %v938_v32 = vmul.f32 0.00390625, %v812_v30  ;;  %v1107_v29 = vadd.s32 4294967256, %v3076_v13 }
 0x16a   : > { %v1135_v36 = vrot.slane %v946_v31, %v3093_v28  ;;  %v1083_v37 = vrot.slane %v938_v32, %v3093_v28 }
 0x16b   : > { %v830_v38 = vpop.xlane.xlu1 %829  ;;  %v814_v39 = vpop.xlane.xlu0 %813 }
 0x16c   : > { %v1136_v40 = vsel %vm1084_vm1, %v1135_v36, %v1131_v34  ;;  %v1085_v41 = vsel %vm1084_vm1, %v1083_v37, %v1078_v35  ;;  %v947_v42 = vmul.f32 0.00390625, %v830_v38  ;;  %v939_v43 = vmul.f32 0.00390625, %v814_v39 }
 0x16d   : > { %v3143_v38 = vsub.s32 %v1107_v29, %v3080_v16  ;;  %v1121_v29 = vadd.s32 4294967240, %v3076_v13 }
 0x16e   : > { %v1140_v44 = vrot.slane %v947_v42, %v3102_v33  ;;  %v1090_v45 = vrot.slane %v939_v43, %v3102_v33 }
 0x16f   : > { %v844_v47 = vpop.xlane.xlu1 %843  ;;  %v842_v48 = vpop.xlane.xlu0 %841 }
 0x170   : > { %v1141_v49 = vsel %vm1091_vm2, %v1140_v44, %v1136_v40  ;;  %v1092_v50 = vsel %vm1091_vm2, %v1090_v45, %v1085_v41  ;;  %v954_v51 = vmul.f32 0.00390625, %v844_v47  ;;  %v953_v52 = vmul.f32 0.00390625, %v842_v48 }
 0x172   : > { %v1174_v53 = vrot.slane %v954_v51, %v3093_v28  ;;  %v1170_v54 = vrot.slane %v953_v52, %v3090_v25 }
 0x173   : > { %v832_v56 = vpop.xlane.xlu1 %831  ;;  %v816_v57 = vpop.xlane.xlu0 %815 }
 0x174   : > { %v1175_v58 = vsel %vm1084_vm1, %v1174_v53, %v1170_v54  ;;  %v948_v59 = vmul.f32 0.00390625, %v832_v56  ;;  %v940_v60 = vmul.f32 0.00390625, %v816_v57 }
 0x176   : > { %v1145_v61 = vrot.slane %v948_v59, %v3118_v55  ;;  %v1097_v62 = vrot.slane %v940_v60, %v3118_v55 }
 0x177   : > { %v858_v0 = vpop.xlane.xlu1 %857  ;;  %v846_v2 = vpop.xlane.xlu0 %845 }
 0x178   : > { %v1146_v3 = vsel %vm1098_vm3, %v1145_v61, %v1141_v49  ;;  %v1099_v4 = vsel %vm1098_vm3, %v1097_v62, %v1092_v50  ;;  %v955_v5 = vmul.f32 0.00390625, %v846_v2  ;;  %v961_v6 = vmul.f32 0.00390625, %v858_v0 }
 0x179   : > { %v1114_v0 = vadd.s32 4294967248, %v3076_v13 }
 0x17a   : > { %v1179_v7 = vrot.slane %v955_v5, %v3102_v33  ;;  %v1209_v15 = vrot.slane %v961_v6, %v3090_v25 }
 0x17b   : > { %v818_v9 = vpop.xlane.xlu1 %817  ;;  %v860_v10 = vpop.xlane.xlu0 %859 }
 0x17c   : > { %v1180_v11 = vsel %vm1091_vm2, %v1179_v7, %v1175_v58  ;;  %v941_v12 = vmul.f32 0.00390625, %v818_v9  ;;  %v962_v14 = vmul.f32 0.00390625, %v860_v10 }
 0x17e   : > { %v1104_v17 = vrot.slane %v941_v12, %v3128_v8  ;;  %v1213_v18 = vrot.slane %v962_v14, %v3093_v28 }
 0x17f   : > { %v848_v19 = vpop.xlane.xlu1 %847  ;;  %v834_v20 = vpop.xlane.xlu0 %833 }
 0x180   : > { %v1106_v21 = vsel %vm1105_vm4, %v1104_v17, %v1099_v4  ;;  %v1214_v22 = vsel %vm1084_vm1, %v1213_v18, %v1209_v15  ;;  %v956_v23 = vmul.f32 0.00390625, %v848_v19  ;;  %v949_v24 = vmul.f32 0.00390625, %v834_v20 }
 0x182   : > { %v1184_v26 = vrot.slane %v956_v23, %v3118_v55  ;;  %v1150_v27 = vrot.slane %v949_v24, %v3128_v8 }
 0x183   : > { %v874_v30 = vpop.xlane.xlu1 %873  ;;  %v862_v31 = vpop.xlane.xlu0 %861 }
 0x184   : > { %v1185_v32 = vsel %vm1098_vm3, %v1184_v26, %v1180_v11  ;;  %v1151_v34 = vsel %vm1105_vm4, %v1150_v27, %v1146_v3  ;;  %v963_v35 = vmul.f32 0.00390625, %v862_v31  ;;  %v969_v36 = vmul.f32 0.00390625, %v874_v30 }
 0x185   : > { %v3167_v11 = vsub.s32 %v1114_v0, %v3080_v16 }
 0x186   : > { %v1218_v37 = vrot.slane %v963_v35, %v3102_v33  ;;  %v1248_v44 = vrot.slane %v969_v36, %v3090_v25 }
 0x187   : > { %v820_v39 = vpop.xlane.xlu1 %819  ;;  %v876_v40 = vpop.xlane.xlu0 %875 }
 0x188   : > { %v1219_v41 = vsel %vm1091_vm2, %v1218_v37, %v1214_v22  ;;  %v942_v42 = vmul.f32 0.00390625, %v820_v39  ;;  %v970_v43 = vmul.f32 0.00390625, %v876_v40 }
 0x18a   : > { %v1111_v45 = vrot.slane %v942_v42, %v3143_v38  ;;  %v1252_v46 = vrot.slane %v970_v43, %v3093_v28 }
 0x18b   : > { %v850_v47 = vpop.xlane.xlu1 %849  ;;  %v836_v48 = vpop.xlane.xlu0 %835 }
 0x18c   : > { %v1113_v49 = vsel %vm1112_vm5, %v1111_v45, %v1106_v21  ;;  %v1253_v50 = vsel %vm1084_vm1, %v1252_v46, %v1248_v44  ;;  %v957_v51 = vmul.f32 0.00390625, %v850_v47  ;;  %v950_v52 = vmul.f32 0.00390625, %v836_v48 }
 0x18e   : > { %v1189_v53 = vrot.slane %v957_v51, %v3128_v8  ;;  %v1155_v54 = vrot.slane %v950_v52, %v3143_v38 }
 0x18f   : > { %v878_v56 = vpop.xlane.xlu1 %877  ;;  %v864_v57 = vpop.xlane.xlu0 %863 }
 0x190   : > { %v1190_v58 = vsel %vm1105_vm4, %v1189_v53, %v1185_v32  ;;  %v1156_v59 = vsel %vm1112_vm5, %v1155_v54, %v1151_v34  ;;  %v971_v60 = vmul.f32 0.00390625, %v878_v56  ;;  %v964_v61 = vmul.f32 0.00390625, %v864_v57 }
 0x191   : > { %v3182_v32 = vsub.s32 %v1121_v29, %v3080_v16 }
 0x192   : > { %v1257_v62 = vrot.slane %v971_v60, %v3102_v33  ;;  %v1223_v63 = vrot.slane %v964_v61, %v3118_v55 }
 0x193   : > { %v892_v2 = vpop.xlane.xlu1 %891  ;;  %v890_v3 = vpop.xlane.xlu0 %889 }
 0x194   : > { %v3159_v4 = vsel %vm1091_vm2, %v1257_v62, %v1253_v50  ;;  %v3162_v5 = vsel %vm1098_vm3, %v1223_v63, %v1219_v41  ;;  %v978_v6 = vmul.f32 0.00390625, %v892_v2  ;;  %v977_v7 = vmul.f32 0.00390625, %v890_v3 }
 0x196   : > { %v1291_v9 = vrot.slane %v978_v6, %v3093_v28  ;;  %v1287_v10 = vrot.slane %v977_v7, %v3090_v25 }
 0x197   : > { %v838_v12 = vpop.xlane.xlu1 %837  ;;  %v822_v14 = vpop.xlane.xlu0 %821 }
 0x198   : > { %v3170_v15 = vsel %vm1084_vm1, %v1291_v9, %v1287_v10  ;;  %v951_v17 = vmul.f32 0.00390625, %v838_v12  ;;  %v943_v18 = vmul.f32 0.00390625, %v822_v14 }
 0x19a   : > { %v1160_v19 = vrot.slane %v951_v17, %v3167_v11  ;;  %v1118_v20 = vrot.slane %v943_v18, %v3167_v11 }
 0x19b   : > { %v866_v21 = vpop.xlane.xlu1 %865  ;;  %v852_v22 = vpop.xlane.xlu0 %851 }
 0x19c   : > { %v1161_v23 = vsel %vm1119_vm6, %v1160_v19, %v1156_v59  ;;  %v1120_v24 = vsel %vm1119_vm6, %v1118_v20, %v1113_v49  ;;  %v958_v46 = vmul.f32 0.00390625, %v852_v22  ;;  %v965_v63 = vmul.f32 0.00390625, %v866_v21 }
 0x19e   : > { %v1194_v50 = vrot.slane %v958_v46, %v3143_v38  ;;  %v1228_v9 = vrot.slane %v965_v63, %v3128_v8 }
 0x19f   : > { %v3176_v26 = vpop.xlane.xlu1 %893  ;;  %v880_v27 = vpop.xlane.xlu0 %879 }
 0x1a0   : > { %v1195_v56 = vsel %vm1112_vm5, %v1194_v50, %v1190_v58  ;;  %v1229_v18 = vsel %vm1105_vm4, %v1228_v9, %v3162_v5 }
 0x1a3   : > { %v908_v30 = vpop.xlane.xlu1 %907  ;;  %v3179_v31 = vpop.xlane.xlu0 %905 }
 0x1a7   : > { %v840_v34 = vpop.xlane.xlu1 %839  ;;  %v824_v35 = vpop.xlane.xlu0 %823 }
 0x1a8   : > { %v952_v36 = vmul.f32 0.00390625, %v840_v34  ;;  %v944_v37 = vmul.f32 0.00390625, %v824_v35 }
 0x1aa   : > { %v1165_v39 = vrot.slane %v952_v36, %v3182_v32  ;;  %v1125_v40 = vrot.slane %v944_v37, %v3182_v32 }
 0x1ab   : > { %v868_v41 = vpop.xlane.xlu1 %867  ;;  %v854_v42 = vpop.xlane.xlu0 %853 }
 0x1ac   : > { %v1166_v13 = vsel %vm1126_vm7, %v1165_v39, %v1161_v23  ;;  %v1127_v43 = vsel %vm1126_vm7, %v1125_v40, %v1120_v24  ;;  %v959_v47 = vmul.f32 0.00390625, %v854_v42  ;;  %v966_v2 = vmul.f32 0.00390625, %v868_v41 }
 0x1ad   : > { %v1402_v44 = vsel %vm1401_vm8, %v1166_v13, %v1127_v43  ;;  %v972_v24 = vmul.f32 0.00390625, %v880_v27  ;;  %v979_v41 = vmul.f32 0.00390625, %v3176_v26  ;;  %v986_v42 = vmul.f32 0.00390625, %v908_v30 }
 0x1ae   : > { %v1199_v51 = vrot.slane %v959_v47, %v3167_v11  ;;  %v1233_v10 = vrot.slane %v966_v2, %v3143_v38  ;;  %v985_v43 = vmul.f32 0.00390625, %v3179_v31 }
 0x1af   : > { %v896_v45 = vpop.xlane.xlu1 %895  ;;  %v882_v16 = vpop.xlane.xlu0 %881  ;;  %v1262_v5 = vrot.slane %v972_v24, %v3118_v55  ;;  %v1330_v26 = vrot.slane %v986_v42, %v3093_v28 }
 0x1b0   : > { %v1200_v59 = vsel %vm1119_vm6, %v1199_v51, %v1195_v56  ;;  %v1234_v19 = vsel %vm1112_vm5, %v1233_v10, %v1229_v18  ;;  %v973_v34 = vmul.f32 0.00390625, %v882_v16  ;;  %v980_v50 = vmul.f32 0.00390625, %v896_v45 }
 0x1b1   : > { %v1263_v47 = vsel %vm1098_vm3, %v1262_v5, %v3159_v4  ;;  %v1326_v31 = vrot.slane %v985_v43, %v3090_v25 }
 0x1b2   : > { %v1267_v13 = vrot.slane %v973_v34, %v3128_v8 }
 0x1b3   : > { %v3188_v48 = vpop.xlane.xlu1 %921  ;;  %v3190_v49 = vpop.xlane.xlu0 %909  ;;  %v1331_v10 = vsel %vm1084_vm1, %v1330_v26, %v1326_v31 }
 0x1b4   : > { %v1268_v30 = vsel %vm1105_vm4, %v1267_v13, %v1263_v47  ;;  %v993_v63 = vmul.f32 0.00390625, %v3188_v48  ;;  %v987_v2 = vmul.f32 0.00390625, %v3190_v49 }
 0x1b7   : > { %v856_v52 = vpop.xlane.xlu1 %855  ;;  %v3194_v53 = vpop.xlane.xlu0 %923 }
 0x1b8   : > { %v960_v54 = vmul.f32 0.00390625, %v856_v52  ;;  %v1296_v52 = vrot.slane %v979_v41, %v3102_v33 }
 0x1ba   : > { %v1204_v57 = vrot.slane %v960_v54, %v3182_v32  ;;  %v1297_v9 = vsel %vm1091_vm2, %v1296_v52, %v3170_v15  ;;  %v1335_v15 = vrot.slane %v987_v2, %v3102_v33  ;;  %v1504_v2 = vld [vmem:[#allocation8 + $0x78] sm:$0xff] }
 0x1bb   : > { %v884_v60 = vpop.xlane.xlu1 %883  ;;  %v870_v61 = vpop.xlane.xlu0 %869 }
 0x1bc   : > { %v1205_v62 = vsel %vm1126_vm7, %v1204_v57, %v1200_v59  ;;  %v967_v3 = vmul.f32 0.00390625, %v870_v61  ;;  %v974_v36 = vmul.f32 0.00390625, %v884_v60 }
 0x1bd   : > { %v1404_v0 = vsel %vm1403_vm9, %v1205_v62, %v1402_v44  ;;  %v1301_v62 = vrot.slane %v980_v50, %v3118_v55 }
 0x1be   : > { %v1238_v58 = vrot.slane %v967_v3, %v3167_v11  ;;  %v1272_v44 = vrot.slane %v974_v36, %v3143_v38 }
 0x1bf   : > { %v912_v6 = vpop.xlane.xlu1 %911  ;;  %v898_v7 = vpop.xlane.xlu0 %897 }
 0x1c0   : > { %v1239_v21 = vsel %vm1119_vm6, %v1238_v58, %v1234_v19  ;;  %v981_v54 = vmul.f32 0.00390625, %v898_v7  ;;  %v1273_v56 = vsel %vm1112_vm5, %v1272_v44, %v1268_v30  ;;  %v988_v58 = vmul.f32 0.00390625, %v912_v6 }
 0x1c2   : > { %v1306_v3 = vrot.slane %v981_v54, %v3128_v8 }
 0x1c3   : > { %v872_v12 = vpop.xlane.xlu1 %871  ;;  %v926_v14 = vpop.xlane.xlu0 %925 }
 0x1c4   : > { %v968_v17 = vmul.f32 0.00390625, %v872_v12  ;;  %v995_v48 = vmul.f32 0.00390625, %v926_v14 }
 0x1c6   : > { %v1243_v20 = vrot.slane %v968_v17, %v3182_v32  ;;  %v994_v17 = vmul.f32 0.00390625, %v3194_v53  ;;  %v1340_v53 = vrot.slane %v988_v58, %v3118_v55  ;;  %v1498_v58 = vld [vmem:[#allocation8 + $0x48] sm:$0xff] }
 0x1c7   : > { %v900_v22 = vpop.xlane.xlu1 %899  ;;  %v886_v23 = vpop.xlane.xlu0 %885 }
 0x1c8   : > { %v1244_v29 = vsel %vm1126_vm7, %v1243_v20, %v1239_v21  ;;  %v975_v37 = vmul.f32 0.00390625, %v886_v23  ;;  %v982_v57 = vmul.f32 0.00390625, %v900_v22  ;;  %v1302_v21 = vsel %vm1098_vm3, %v1301_v62, %v1297_v9  ;;  %v1500_v9 = vld [vmem:[#allocation8 + $0x58] sm:$0xff] }
 0x1c9   : > { %v1406_v35 = vsel %vm1405_vm10, %v1244_v29, %v1404_v0  ;;  %v1365_v22 = vrot.slane %v993_v63, %v3090_v25  ;;  %v1307_v6 = vsel %vm1105_vm4, %v1306_v3, %v1302_v21  ;;  %v1490_v21 = vld [vmem:[#allocation8 + $0x8] sm:$0xff] }
 0x1ca   : > { %v1277_v27 = vrot.slane %v975_v37, %v3167_v11  ;;  %v1311_v12 = vrot.slane %v982_v57, %v3143_v38  ;;  %v1369_v37 = vrot.slane %v994_v17, %v3093_v28  ;;  %v1496_v17 = vld [vmem:[#allocation8 + $0x38] sm:$0xff] }
 0x1cb   : > { %v928_v39 = vpop.xlane.xlu1 %927  ;;  %v914_v40 = vpop.xlane.xlu0 %913 }
 0x1cc   : > { %v1278_v60 = vsel %vm1119_vm6, %v1277_v27, %v1273_v56  ;;  %v989_v18 = vmul.f32 0.00390625, %v914_v40  ;;  %v996_v29 = vmul.f32 0.00390625, %v928_v39  ;;  %v1312_v14 = vsel %vm1112_vm5, %v1311_v12, %v1307_v6  ;;  %v1497_v12 = vld [vmem:[#allocation8 + $0x40] sm:$0xff] }
 0x1cd   : > { %v1374_v40 = vrot.slane %v995_v48, %v3102_v33  ;;  %v1336_v27 = vsel %vm1091_vm2, %v1335_v15, %v1331_v10  ;;  %v1499_v10 = vld [vmem:[#allocation8 + $0x50] sm:$0xff] }
 0x1ce   : > { %v1345_v25 = vrot.slane %v989_v18, %v3128_v8  ;;  %v1495_v48 = vld [vmem:[#allocation8 + $0x30] sm:$0xff]  ;;  %v1494_v18 = vld [vmem:[#allocation8 + $0x28] sm:$0xff] }
 0x1cf   : > { %v902_v46 = vpop.xlane.xlu1 %901  ;;  %v888_v16 = vpop.xlane.xlu0 %887 }
 0x1d0   : > { %v976_v51 = vmul.f32 0.00390625, %v888_v16  ;;  %v983_v4 = vmul.f32 0.00390625, %v902_v46  ;;  %v1379_v46 = vrot.slane %v996_v29, %v3118_v55  ;;  %v1341_v16 = vsel %vm1098_vm3, %v1340_v53, %v1336_v27  ;;  %v1674_v53 = vld [vmem:[#allocation9 + $0x70] sm:$0xff]  ;;  %v1660_v27 = vld [vmem:[#allocation9] sm:$0xff] }
 0x1d1   : > { %v1346_v52 = vsel %vm1105_vm4, %v1345_v25, %v1341_v16  ;;  %v1668_v25 = vld [vmem:[#allocation9 + $0x40] sm:$0xff] }
 0x1d2   : > { %v1282_v59 = vrot.slane %v976_v51, %v3182_v32  ;;  %v1316_v19 = vrot.slane %v983_v4, %v3167_v11  ;;  %v1370_v51 = vsel %vm1084_vm1, %v1369_v37, %v1365_v22  ;;  %v1489_v22 = vld [vmem:[#allocation8] sm:$0xff]  ;;  %v1670_v37 = vld [vmem:[#allocation9 + $0x50] sm:$0xff] }
 0x1d3   : > { %v930_v45 = vpop.xlane.xlu1 %929  ;;  %v916_v61 = vpop.xlane.xlu0 %915  ;;  %v1375_v55 = vsel %vm1091_vm2, %v1374_v40, %v1370_v51  ;;  %v1669_v40 = vld [vmem:[#allocation9 + $0x48] sm:$0xff] }
 0x1d4   : > { %v1283_v0 = vsel %vm1126_vm7, %v1282_v59, %v1278_v60  ;;  %v990_v23 = vmul.f32 0.00390625, %v916_v61  ;;  %v1317_v5 = vsel %vm1119_vm6, %v1316_v19, %v1312_v14  ;;  %v1380_v59 = vsel %vm1098_vm3, %v1379_v46, %v1375_v55  ;;  %v1493_v19 = vld [vmem:[#allocation8 + $0x20] sm:$0xff]  ;;  %v1673_v14 = vld [vmem:[#allocation9 + $0x68] sm:$0xff] }
 0x1d5   : > { %v1408_v7 = vsel %vm1407_vm11, %v1283_v0, %v1406_v35  ;;  %v997_v35 = vmul.f32 0.00390625, %v930_v45 }
 0x1d6   : > { %v1350_v39 = vrot.slane %v990_v23, %v3143_v38 }
 0x1d7   : > { %v918_v49 = vpop.xlane.xlu1 %917  ;;  %v904_v20 = vpop.xlane.xlu0 %903  ;;  %v1384_v47 = vrot.slane %v997_v35, %v3128_v8  ;;  %v1672_v35 = vld [vmem:[#allocation9 + $0x60] sm:$0xff] }
 0x1d8   : > { %v984_v24 = vmul.f32 0.00390625, %v904_v20  ;;  %v991_v34 = vmul.f32 0.00390625, %v918_v49  ;;  %v1351_v31 = vsel %vm1112_vm5, %v1350_v39, %v1346_v52  ;;  %v1492_v49 = vld [vmem:[#allocation8 + $0x18] sm:$0xff]  ;;  %v1491_v20 = vld [vmem:[#allocation8 + $0x10] sm:$0xff]  ;;  %v1664_v39 = vld [vmem:[#allocation9 + $0x20] sm:$0xff] }
 0x1d9   : > { %v1385_v60 = vsel %vm1105_vm4, %v1384_v47, %v1380_v59 }
 0x1da   : > { %v1321_v36 = vrot.slane %v984_v24, %v3182_v32  ;;  %v1355_v28 = vrot.slane %v991_v34, %v3167_v11  ;;  %v1675_v34 = vld [vmem:[#allocation9 + $0x78] sm:$0xff] }
 0x1db   : > { %v920_v41 = vpop.xlane.xlu1 %919  ;;  %v932_v42 = vpop.xlane.xlu0 %931 }
 0x1dc   : > { %v1322_v13 = vsel %vm1126_vm7, %v1321_v36, %v1317_v5  ;;  %v992_v43 = vmul.f32 0.00390625, %v920_v41  ;;  %v998_v44 = vmul.f32 0.00390625, %v932_v42  ;;  %v1356_v8 = vsel %vm1119_vm6, %v1355_v28, %v1351_v31  ;;  %v1671_v36 = vld [vmem:[#allocation9 + $0x58] sm:$0xff]  ;;  %v1666_v41 = vld [vmem:[#allocation9 + $0x30] sm:$0xff]  ;;  %v1665_v42 = vld [vmem:[#allocation9 + $0x28] sm:$0xff] }
 0x1dd   : > { %v1410_v33 = vsel %vm1409_vm12, %v1322_v13, %v1408_v7  ;;  %v1503_v7 = vld [vmem:[#allocation8 + $0x70] sm:$0xff]  ;;  %v1667_v5 = vld [vmem:[#allocation9 + $0x38] sm:$0xff] }
 0x1de   : > { %v1360_v50 = vrot.slane %v992_v43, %v3182_v32  ;;  %v1389_v26 = vrot.slane %v998_v44, %v3143_v38  ;;  %v1663_v13 = vld [vmem:[#allocation9 + $0x18] sm:$0xff]  ;;  %v1662_v43 = vld [vmem:[#allocation9 + $0x10] sm:$0xff]  ;;  %v1661_v44 = vld [vmem:[#allocation9 + $0x8] sm:$0xff] }
 0x1df   : > { %v934_v30 = vpop.xlane.xlu0 %933  ;;  %v936_v54 = vpop.xlane.xlu1 %935 }
 0x1e0   : > { %v999_v56 = vmul.f32 0.00390625, %v934_v30  ;;  %v1000_v57 = vmul.f32 0.00390625, %v936_v54  ;;  %v1361_v4 = vsel %vm1126_vm7, %v1360_v50, %v1356_v8  ;;  %v1390_v61 = vsel %vm1112_vm5, %v1389_v26, %v1385_v60 }
 0x1e1   : > { %v1412_v0 = vsel %vm1411_vm13, %v1361_v4, %v1410_v33 }
 0x1e2   : > { %v1394_v45 = vrot.slane %v999_v56, %v3167_v11  ;;  %v1399_v38 = vrot.slane %v1000_v57, %v3182_v32  ;;  %v1502_v11 = vld [vmem:[#allocation8 + $0x68] sm:$0xff]  ;;  %v1501_v32 = vld [vmem:[#allocation8 + $0x60] sm:$0xff] }
 0x1e4   : > { %v1395_v62 = vsel %vm1119_vm6, %v1394_v45, %v1390_v61 }
 0x1e5   : > { %v1400_v63 = vsel %vm1126_vm7, %v1399_v38, %v1395_v62 }
 0x1e6   : > { %v1414_v3 = vsel %vm1413_vm14, %v1400_v63, %v1412_v0 }
 0x1e7   : > { %2093 = vmatmul.mubr.msk.f32.vlgmr.msra.gmra.mxu1 %vm1415_vm15, %v1414_v3  ;;  %2147 = vmatmul.mubr.msk.f32.vlgmr.msra.gmra.mxu0 %vm1415_vm15, %v1414_v3 }
 0x1e8   : > { %2096 = vmatpush3.msra.mxu1 %v1504_v2  ;;  %2127 = vmatprep.mubr.msk.f32.mxu1 %vm2675_vm0, %v2674_v1 }
 0x1e9   : > { %2097 = vmatprep.subr.mxu1 %v2674_v1  ;;  %2181 = vmatprep.mubr.msk.f32.mxu0 %vm2675_vm0, %v2674_v1 }
 0x1ea   : > { %2098 = vmatpush3.msra.mxu1 %v1503_v7  ;;  %2150 = vmatpush3.msra.mxu0 %v1675_v34 }
 0x1eb   : > { %2099 = vmatprep.subr.mxu1 %v2674_v1  ;;  %2151 = vmatprep.subr.mxu0 %v2674_v1 }
 0x1ec   : > { %2100 = vmatpush3.msra.mxu1 %v1502_v11  ;;  %2152 = vmatpush3.msra.mxu0 %v1674_v53 }
 0x1ed   : > { %2101 = vmatprep.subr.mxu1 %v2674_v1  ;;  %2153 = vmatprep.subr.mxu0 %v2674_v1 }
 0x1ee   : > { %2102 = vmatpush3.msra.mxu1 %v1501_v32  ;;  %2154 = vmatpush3.msra.mxu0 %v1673_v14 }
 0x1ef   : > { %2103 = vmatprep.subr.mxu1 %v2674_v1  ;;  %2155 = vmatprep.subr.mxu0 %v2674_v1 }
 0x1f0   : > { %2104 = vmatpush3.msra.mxu1 %v1500_v9  ;;  %2156 = vmatpush3.msra.mxu0 %v1672_v35 }
 0x1f1   : > { %2105 = vmatprep.subr.mxu1 %v2674_v1  ;;  %2157 = vmatprep.subr.mxu0 %v2674_v1 }
 0x1f2   : > { %2106 = vmatpush3.msra.mxu1 %v1499_v10  ;;  %2158 = vmatpush3.msra.mxu0 %v1671_v36 }
 0x1f3   : > { %2107 = vmatprep.subr.mxu1 %v2674_v1  ;;  %2159 = vmatprep.subr.mxu0 %v2674_v1 }
 0x1f4   : > { %2108 = vmatpush3.msra.mxu1 %v1498_v58  ;;  %2160 = vmatpush3.msra.mxu0 %v1670_v37 }
 0x1f5   : > { %2109 = vmatprep.subr.mxu1 %v2674_v1  ;;  %2161 = vmatprep.subr.mxu0 %v2674_v1 }
 0x1f6   : > { %2110 = vmatpush3.msra.mxu1 %v1497_v12  ;;  %2162 = vmatpush3.msra.mxu0 %v1669_v40 }
 0x1f7   : > { %2111 = vmatprep.subr.mxu1 %v2674_v1  ;;  %2163 = vmatprep.subr.mxu0 %v2674_v1 }
 0x1f8   : > { %2112 = vmatpush3.msra.mxu1 %v1496_v17  ;;  %2164 = vmatpush3.msra.mxu0 %v1668_v25 }
 0x1f9   : > { %2113 = vmatprep.subr.mxu1 %v2674_v1  ;;  %2165 = vmatprep.subr.mxu0 %v2674_v1 }
 0x1fa   : > { %2114 = vmatpush3.msra.mxu1 %v1495_v48  ;;  %2166 = vmatpush3.msra.mxu0 %v1667_v5 }
 0x1fb   : > { %2115 = vmatprep.subr.mxu1 %v2674_v1  ;;  %2167 = vmatprep.subr.mxu0 %v2674_v1 }
 0x1fc   : > { %2116 = vmatpush3.msra.mxu1 %v1494_v18  ;;  %2168 = vmatpush3.msra.mxu0 %v1666_v41 }
 0x1fd   : > { %2117 = vmatprep.subr.mxu1 %v2674_v1  ;;  %2169 = vmatprep.subr.mxu0 %v2674_v1 }
 0x1fe   : > { %2118 = vmatpush3.msra.mxu1 %v1493_v19  ;;  %2170 = vmatpush3.msra.mxu0 %v1665_v42 }
 0x1ff   : > { %2119 = vmatprep.subr.mxu1 %v2674_v1  ;;  %2171 = vmatprep.subr.mxu0 %v2674_v1 }
 0x200   : > { %2120 = vmatpush3.msra.mxu1 %v1492_v49  ;;  %2172 = vmatpush3.msra.mxu0 %v1664_v39 }
 0x201   : > { %2121 = vmatprep.subr.mxu1 %v2674_v1  ;;  %2173 = vmatprep.subr.mxu0 %v2674_v1 }
 0x202   : > { %2122 = vmatpush3.msra.mxu1 %v1491_v20  ;;  %2174 = vmatpush3.msra.mxu0 %v1663_v13 }
 0x203   : > { %2123 = vmatprep.subr.mxu1 %v2674_v1  ;;  %2175 = vmatprep.subr.mxu0 %v2674_v1 }
 0x204   : > { %2124 = vmatpush3.msra.mxu1 %v1490_v21  ;;  %2176 = vmatpush3.msra.mxu0 %v1662_v43 }
 0x205   : > { %2125 = vmatprep.subr.mxu1 %v2674_v1  ;;  %2177 = vmatprep.subr.mxu0 %v2674_v1 }
 0x206   : > { %2126 = vmatpush3.msra.mxu1 %v1489_v22  ;;  %2178 = vmatpush3.msra.mxu0 %v1661_v44 }
 0x207   : > { %2179 = vmatprep.subr.mxu0 %v2674_v1  ;;  %v2014_v1 = vld [vmem:[%s3489_s8] ss:$0 sm:$0xff] }
 0x208   : > { %2180 = vmatpush3.msra.mxu0 %v1660_v27 }
 0x2a7   : > { %v1484_v23 = vpop.f32.mrf.mxu1  ;;  %v1655_v24 = vpop.f32.mrf.mxu0 }
 0x2a8   : > { %v1488_v15 = vmax.f32 %v1484_v23, 0.0 }
 0x2a9   : > { %v2094_v6 = vpop.f32.mrf.mxu1  ;;  %v2148_v29 = vpop.f32.mrf.mxu0 }
 0x2aa   : > { %2128 = vmatmul.mubr.f32.vlgmr.msra.gmra.mxu1 %v1488_v15 }
 0x36a   : > { %v1571_v46 = vpop.f32.mrf.mxu1 }
 0x36b   : > { %v2012_v28 = vmul.f32 -1.442695, %v1571_v46 }
 0x36c   : > { %v2129_v33 = vpop.f32.mrf.mxu1 }
 0x36d   : > { %2343 = vpow2.f32 %v2012_v28 }
 0x37a   : > { %v2344_v16 = vpop.eup %2343 }
 0x37b   : > { %v1578_v47 = vadd.f32 1.0, %v2344_v16 }
 0x37d   : > { %2345 = vrcp.f32 %v1578_v47 }
 0x38a   : > { %v2346_v50 = vpop.eup %2345 }
 0x38b   : > { %1755 = vst [vmem:[%s415_s30] sm:$0xff] %v2346_v50  ;;  %v1659_v51 = vmul.f32 %v2346_v50, %v1655_v24 }
 0x38d   : > { %2182 = vmatmul.mubr.f32.vlgmr.msra.gmra.mxu0 %v1659_v51  ;;  %1754 = vst [vmem:[%s408_s21] sm:$0xff] %v1659_v51 }
 0x44d   : > { %v1749_v52 = vpop.f32.mrf.mxu0 }
 0x44e   : > { %v1750_v26 = vadd.f32 %v2014_v1, %v1749_v52 }
 0x44f   : > { %v2183_v30 = vpop.f32.mrf.mxu0 }
 0x450   : > { %1753 = vst [vmem:[%s401_s18] sm:$0xff] %v1750_v26 }
 0x451 PF: > { %s3490_s23 = sld [smem:[#allocation22_spill]]  ;;  %s1761_s22 = sand.u32 1, %s2778_s16  }
 0x452   : > { %s3492_s24 = sld [smem:[#allocation33_spill]]  ;;  %s1793_s27 = sshll.u32 %s408_s21, 4  ;;  %s1794_s27 = int_to_ptr.vmem [resolvable:$true] %s1793_s27 }
 0x453   : > { %s3493_s11 = sld [smem:[#allocation32_spill]]  ;;  %s3331_s4 = scalar_lea.sflag [#allocation14], %s1761_s22 }
 0x454   : > { %s2479_s16 = scalar_lea.vmem %s1794_s27, 128 }
 0x455   : > { %p2480_p9 = scmp.ne.s32.totalorder %s1794_s27, %s2479_s16 }
 0x457   : > { %s3315_s12 = sshll.u32 %s3490_s23, 7  ;;  %p2481_p1 = pnand %p2480_p9, %p2794_p6 }
 0x458   : > { %s3321_s1 = scalar_lea.hbm %s3492_s24, %s3315_s12  ;;  %s2676_s23 = smov [#allocation13]  }
 0x459   : > { %s3494_s25 = smov %s3493_s11  ;;  %s3329_s8 = scalar_lea.hbm %s3493_s11, %s3315_s12 }
 0x45a   : > { %p2482_p0 = pneg %p2481_p1  ;;  %s2483_s5 = sshll.u32 %s2676_s23, 4  ;;  %s2484_s5 = int_to_ptr.vmem [resolvable:$false] %s2483_s5 }
 0x45b   : > { %s2485_s19 = scalar_lea.vmem %s2484_s5, 256  ;;  %p2486_p12 = scmp.lt.s32.totalorder %s1794_s27, %s2484_s5 }
 0x45c   : > { %p2487_p2 = scmp.lt.s32.totalorder %s2485_s19, %s2479_s16 }
 0x45e   : > { %p2488_p5 = por %p2487_p2, %p2486_p12 }
 0x460   : > { %p2489_p7 = pnand %p2488_p5, %p2482_p0 }
 0x462   : > { %2492 = shalt.err (!%p2489_p7)
}
 0x463   : > { %s2493_s21 = scalar_lea.hbm %s3321_s1, 128  ;;  %s2497_s6 = scalar_lea.hbm %s3492_s24, 256 }
 0x464   : > { %p2494_p10 = scmp.ne.s32.totalorder %s3321_s1, %s2493_s21  ;;  %p2498_p13 = scmp.lt.s32.totalorder %s3321_s1, %s3492_s24 }
 0x465   : > { %p2499_p4 = scmp.lt.s32.totalorder %s2497_s6, %s2493_s21 }
 0x466   : > { %p2495_p3 = pnand %p2494_p10, %p2794_p6 }
 0x467   : > { %p2500_p8 = por %p2499_p4, %p2498_p13 }
 0x468   : > { %p2496_p11 = pneg %p2495_p3 }
 0x46a   : > { %p2501_p9 = pnand %p2500_p8, %p2496_p11 }
 0x46c   : > { %2504 = shalt.err (!%p2501_p9)
}
 0x46d   : > { %2203 = dma.vmem_to_hbm [thread:$0]  (%p2794_p6), %s1794_s27, 128, %s3321_s1, %s3331_s4  }
 0x46e   : > { %s1780_s16 = sshll.u32 %s401_s18, 4  ;;  %s3495_s22 = sld [smem:[#allocation34_spill]]  ;;  %s1781_s16 = int_to_ptr.vmem [resolvable:$true] %s1780_s16 }
 0x46f   : > { %s1806_s21 = sshll.u32 %s415_s30, 4  ;;  %s3496_s6 = sand.u32 1, %s2627_s28   ;;  %s1807_s21 = int_to_ptr.vmem [resolvable:$true] %s1806_s21 }
 0x470   : > { %s1757_s11 = scalar_lea.sflag [#allocation5], %s3496_s6  ;;  %s2505_s23 = scalar_lea.vmem %s1781_s16, 128 }
 0x471   : > { %p2506_p1 = scmp.ne.s32.totalorder %s1781_s16, %s2505_s23  ;;  %s2677_s0 = smov [#allocation12]  }
 0x472   : > { %s2509_s24 = sshll.u32 %s2677_s0, 4  ;;  %s2510_s24 = int_to_ptr.vmem [resolvable:$false] %s2509_s24 }
 0x473   : > { %p2507_p0 = pnand %p2506_p1, %p2794_p6  ;;  %s2511_s1 = scalar_lea.vmem %s2510_s24, 256 }
 0x474   : > { %s3356_s26 = scalar_lea.hbm %s3495_s22, %s3315_s12  ;;  %p2512_p2 = scmp.lt.s32.totalorder %s1781_s16, %s2510_s24 }
 0x475   : > { %p2508_p12 = pneg %p2507_p0  ;;  %p2513_p5 = scmp.lt.s32.totalorder %s2511_s1, %s2505_s23 }
 0x477   : > { %p2514_p7 = por %p2513_p5, %p2512_p2 }
 0x479   : > { %p2515_p10 = pnand %p2514_p7, %p2508_p12 }
 0x47b   : > { %2518 = shalt.err (!%p2515_p10)
}
 0x47c   : > { %s2519_s7 = scalar_lea.hbm %s3329_s8, 128  ;;  %s2523_s0 = scalar_lea.hbm %s3494_s25, 256 }
 0x47d   : > { %p2520_p3 = scmp.ne.s32.totalorder %s3329_s8, %s2519_s7  ;;  %p2524_p4 = scmp.lt.s32.totalorder %s3329_s8, %s3494_s25 }
 0x47e   : > { %p2525_p8 = scmp.lt.s32.totalorder %s2523_s0, %s2519_s7 }
 0x47f   : > { %p2521_p11 = pnand %p2520_p3, %p2794_p6 }
 0x480   : > { %p2526_p9 = por %p2525_p8, %p2524_p4 }
 0x481   : > { %p2522_p13 = pneg %p2521_p11 }
 0x483   : > { %p2527_p1 = pnand %p2526_p9, %p2522_p13 }
 0x485   : > { %2530 = shalt.err (!%p2527_p1)
}
 0x486   : > { %2202 = dma.vmem_to_hbm [thread:$0]  (%p2794_p6), %s1781_s16, 128, %s3329_s8, %s1757_s11  }
 0x487   : > { %s2531_s24 = scalar_lea.vmem %s1807_s21, 128  ;;  %s2678_s5 = smov [#allocation15]  }
 0x488   : > { %p2532_p0 = scmp.ne.s32.totalorder %s1807_s21, %s2531_s24  ;;  %s2535_s19 = sshll.u32 %s2678_s5, 4  ;;  %s2536_s19 = int_to_ptr.vmem [resolvable:$false] %s2535_s19 }
 0x489   : > { %s2537_s6 = scalar_lea.vmem %s2536_s19, 256  ;;  %p2538_p5 = scmp.lt.s32.totalorder %s1807_s21, %s2536_s19 }
 0x48a   : > { %p2533_p12 = pnand %p2532_p0, %p2794_p6  ;;  %p2539_p7 = scmp.lt.s32.totalorder %s2537_s6, %s2531_s24 }
 0x48c   : > { %p2534_p2 = pneg %p2533_p12  ;;  %p2540_p10 = por %p2539_p7, %p2538_p5 }
 0x48e   : > { %p2541_p3 = pnand %p2540_p10, %p2534_p2 }
 0x490   : > { %2544 = shalt.err (!%p2541_p3)
}
 0x491   : > { %s2545_s8 = scalar_lea.hbm %s3356_s26, 128  ;;  %s2549_s23 = scalar_lea.hbm %s3495_s22, 256 }
 0x492   : > { %p2546_p11 = scmp.ne.s32.totalorder %s3356_s26, %s2545_s8  ;;  %p2550_p8 = scmp.lt.s32.totalorder %s3356_s26, %s3495_s22 }
 0x493   : > { %p2551_p9 = scmp.lt.s32.totalorder %s2549_s23, %s2545_s8 }
 0x494   : > { %p2547_p13 = pnand %p2546_p11, %p2794_p6 }
 0x495   : > { %p2552_p1 = por %p2551_p9, %p2550_p8 }
 0x496   : > { %p2548_p4 = pneg %p2547_p13 }
 0x498   : > { %p2553_p0 = pnand %p2552_p1, %p2548_p4 }
 0x49a   : > { %2556 = shalt.err (!%p2553_p0)
}
 0x49b   : > { %2204 = dma.vmem_to_hbm [thread:$0]  (%p2794_p6), %s1807_s21, 128, %s3356_s26, %s3331_s4  }
 0x49c PF: > { %s3497_s18 = sld [smem:[#allocation21_spill]]  ;;  %p2244_p12 = scmp.ge.s32.totalorder %s2663_s15, 2 }
 0x49d   : > { %s3498_s30 = sld [smem:[#allocation24_spill]] }
 0x4a2   : > { %s1818_s0 = sand.u32 1, %s3497_s18  }
 0x4a3   : > { %p3499_p2 = scmp.ne.s32.totalorder %s3498_s30, 0  ;;  %s1819_s12 = scalar_lea.sflag [#allocation5], %s1818_s0 }
 0x4a5   : > { %p2226_p5 = pnand %p2244_p12, %p3499_p2 }
 0x4a7   : > { %p2227_p7 = pneg %p2226_p5 }
 0x4a9   : > { %2614 = dma.done.wait (%p2227_p7), %s1819_s12, 128  }
 0x4aa   : > { %2616 = vsyncadd (%p2227_p7), %s1819_s12, 4294967168  ;;  %s3500_s27 = sadd.s32 4294967294, %s2663_s15  }
 0x4ab   : > { %s1827_s24 = sand.u32 1, %s3500_s27  }
 0x4ac   : > { %s1828_s5 = scalar_lea.sflag [#allocation14], %s1827_s24 }
 0x4ad   : > { %2618 = dma.done.wait (%p2227_p7), %s1828_s5, 256  }
 0x4ae   : > { %2620 = vsyncadd (%p2227_p7), %s1828_s5, 4294967040  ;;  %s30_s15 = sadd.s32 1, %s2663_s15   ;;  %s3501_s4 = sld [smem:[#allocation25_spill]] }
 0x4af   : > { %p27_p6 = scmp.ge.s32.totalorder %s30_s15, 6   ;;  %s3502_s27 = smov %s2627_s28 }
 0x4b0   : > { %s3503_s28 = smov %s2631_s29  ;;  %s3504_s29 = smov %s2888_s17 }
 0x4b1   : > { %s3505_s30 = smov %s2639_s9  ;;  %s3506_s9 = smov %s2643_s10 }
 0x4b2   : > { %s3507_s10 = smov %s2891_s2  ;;  %s3508_s11 = smov %s2655_s13 }
 0x4b3   : > { %s3509_s12 = smov %s2659_s14  ;;  %s3511_s14 = smov %s3517_s20 }
 0x4b4   : > { %s3510_s13 = smov %s3501_s4  ;;  %29 = sbr.rel (!%p27_p6) target bundleno = 23 (0x17), region = 145 }
 0x4b9   :  { %1842 = vsyncpa [#allocation4], 1 }
 0x4ba   :  { %1844 = vsyncpa [#allocation4 + $0x1], 1 }
 0x4bb   :  { %1845 = vsyncpa [#allocation7], 1 }
 0x4bc   :  { %1846 = vsyncpa [#allocation10], 1 }
 0x4bd   :  { %1847 = vsyncpa [#allocation5], 1 }
 0x4be   :  { %1849 = vsyncpa [#allocation5 + $0x1], 1 }
 0x4bf   :  { %1850 = vsyncpa [#allocation14], 1 }
 0x4c0   :  { %1852 = vsyncpa [#allocation14 + $0x1], 1 }

</bundles_post_ra>
